<compile_context>
chip_gen: v5e
topology: v5e:2x2
jax: 0.10.0
libtpu: 0.0.40
codegen_flags: <defaults>
</compile_context>

<pallas_src>
import jax
import jax.numpy as jnp
from jax.experimental import pallas as pl
from jax.experimental.pallas import tpu as pltpu


def _gru_encoder_kernel(x_ref, wih_ref, whh_ref, bi_ref, bhn_ref,
                        ann_ref, hfin_ref, h_scratch):
    t = pl.program_id(1)

    @pl.when(t == 0)
    def _():
        # New batch block (or very first step): reset the carried hidden state.
        h_scratch[...] = jnp.zeros_like(h_scratch)

    b_blk, t_c, h_dim = x_ref.shape

    # ---- chunk-batched input projection (independent of the recurrence) ----
    x2 = x_ref[...].reshape(b_blk * t_c, h_dim)                      # (B_blk*T_C, H)
    gi_r = (jnp.dot(x2, wih_ref[0], preferred_element_type=jnp.float32)
            + bi_ref[0]).reshape(b_blk, t_c, h_dim)
    gi_z = (jnp.dot(x2, wih_ref[1], preferred_element_type=jnp.float32)
            + bi_ref[1]).reshape(b_blk, t_c, h_dim)
    gi_n = (jnp.dot(x2, wih_ref[2], preferred_element_type=jnp.float32)
            + bi_ref[2]).reshape(b_blk, t_c, h_dim)

    w_hr = whh_ref[0]
    w_hz = whh_ref[1]
    w_hn = whh_ref[2]
    b_hn = bhn_ref[...]                                              # (1, H)

    # ---- serial recurrence over the chunk (static unroll) ----
    h = h_scratch[...]                                               # (B_blk, H)
    for i in range(t_c):
        h_r = jnp.dot(h, w_hr, preferred_element_type=jnp.float32)
        h_z = jnp.dot(h, w_hz, preferred_element_type=jnp.float32)
        h_n = jnp.dot(h, w_hn, preferred_element_type=jnp.float32) + b_hn
        r = jax.nn.sigmoid(gi_r[:, i, :] + h_r)
        z = jax.nn.sigmoid(gi_z[:, i, :] + h_z)
        n = jnp.tanh(gi_n[:, i, :] + r * h_n)
        h = (1.0 - z) * n + z * h
        ann_ref[:, i, :] = h

    h_scratch[...] = h

    @pl.when(t == pl.num_programs(1) - 1)
    def _():
        hfin_ref[0] = h


def _pick_time_block(seq_len, max_block=32):
    """Largest multiple of 8 that divides seq_len (capped), else the full seq."""
    if seq_len % 8 != 0:
        return seq_len
    best = 8
    for cand in range(8, min(seq_len, max_block) + 1, 8):
        if seq_len % cand == 0:
            best = cand
    return best


def gru_encoder_forward(token_ids, embedding, w_ih, w_hh, b_ih, b_hh,
                        *, time_block=None, batch_block=None):
    """token_ids: (B, S) int32.  embedding: (V, H).  w_ih/w_hh: (3H, H),
    b_ih/b_hh: (3H,)   (torch.nn.GRUCell layout, gate order r,z,n).
    Returns (annotations (B, S, H), hidden (B, H))."""
    B, S = token_ids.shape
    H = embedding.shape[1]

    if time_block is None:
        time_block = _pick_time_block(S)
    if batch_block is None:
        batch_block = B
    assert S % time_block == 0, "seq_len must be divisible by time_block"
    assert time_block == S or time_block % 8 == 0
    assert B % batch_block == 0
    n_b = B // batch_block
    n_t = S // time_block

    # Embedding lookup (glue). Natural (B, S, H) layout -- no HBM transposes.
    # TODO(synk): fuse the gather into the kernel (scalar-prefetched ids +
    # VMEM-resident table) when vocab_size * H comfortably fits in VMEM.
    x = jnp.take(embedding.astype(jnp.float32), token_ids, axis=0)    # (B, S, H)

    # Per-gate weight matrices, transposed so the kernel computes v @ W_g^T.
    wih_t = jnp.transpose(w_ih.astype(jnp.float32).reshape(3, H, H), (0, 2, 1))
    whh_t = jnp.transpose(w_hh.astype(jnp.float32).reshape(3, H, H), (0, 2, 1))

    bih = b_ih.astype(jnp.float32).reshape(3, 1, H)
    bhh = b_hh.astype(jnp.float32).reshape(3, 1, H)
    # Fold hidden-side r/z biases into the input-side biases; the n-gate
    # hidden bias must stay separate because it is gated by r.
    bi = jnp.concatenate([bih[0:1] + bhh[0:1],
                          bih[1:2] + bhh[1:2],
                          bih[2:3]], axis=0)                          # (3, 1, H)
    bhn = bhh[2]                                                      # (1, H)

    ann, hfin = pl.pallas_call(
        _gru_encoder_kernel,
        out_shape=(
            jax.ShapeDtypeStruct((B, S, H), jnp.float32),
            jax.ShapeDtypeStruct((n_b, batch_block, H), jnp.float32),
        ),
        grid_spec=pltpu.PrefetchScalarGridSpec(
            num_scalar_prefetch=0,
            grid=(n_b, n_t),
            in_specs=[
                pl.BlockSpec((batch_block, time_block, H),
                             lambda b, t: (b, t, 0)),                 # x chunk
                pl.BlockSpec((3, H, H), lambda b, t: (0, 0, 0)),      # W_ih^T per gate
                pl.BlockSpec((3, H, H), lambda b, t: (0, 0, 0)),      # W_hh^T per gate
                pl.BlockSpec((3, 1, H), lambda b, t: (0, 0, 0)),      # folded biases
                pl.BlockSpec((1, H), lambda b, t: (0, 0)),            # b_hh_n
            ],
            out_specs=[
                pl.BlockSpec((batch_block, time_block, H),
                             lambda b, t: (b, t, 0)),                 # annotations
                pl.BlockSpec((1, batch_block, H),
                             lambda b, t: (b, 0, 0)),                 # final hidden
            ],
            scratch_shapes=[pltpu.VMEM((batch_block, H), jnp.float32)],
        ),
        compiler_params=pltpu.CompilerParams(
            dimension_semantics=("parallel", "arbitrary")),           # batch ∥, time serial
    )(x, wih_t, whh_t, bi, bhn)

    hidden = hfin.reshape(B, H)       # metadata-only reshape (row-major match)
    return ann, hidden


def _reference_forward(token_ids, embedding, w_ih, w_hh, b_ih, b_hh):
    """Pure-JAX reference mirroring torch.nn.GRUCell semantics."""
    B, S = token_ids.shape
    H = embedding.shape[1]
    encoded = jnp.take(embedding, token_ids, axis=0)
    h = jnp.zeros((B, H), jnp.float32)
    anns = []
    for i in range(S):
        xx = encoded[:, i, :]
        gi = xx @ w_ih.T + b_ih
        gh = h @ w_hh.T + b_hh
        i_r, i_z, i_n = gi[:, :H], gi[:, H:2 * H], gi[:, 2 * H:]
        h_r, h_z, h_n = gh[:, :H], gh[:, H:2 * H], gh[:, 2 * H:]
        r = jax.nn.sigmoid(i_r + h_r)
        z = jax.nn.sigmoid(i_z + h_z)
        n = jnp.tanh(i_n + r * h_n)
        h = (1.0 - z) * n + z * h
        anns.append(h)
    return jnp.stack(anns, axis=1), h


if __name__ == "__main__":
    vocab_size = 20
    hidden_size = 32
    batch_size = 4
    seq_len = 16

    key = jax.random.PRNGKey(0)
    k_emb, k_wih, k_whh, k_bih, k_bhh, k_ids = jax.random.split(key, 6)

    scale = 1.0 / (hidden_size ** 0.5)
    embedding = jax.random.normal(k_emb, (vocab_size, hidden_size), jnp.float32)
    w_ih = jax.random.uniform(k_wih, (3 * hidden_size, hidden_size), jnp.float32,
                              -scale, scale)
    w_hh = jax.random.uniform(k_whh, (3 * hidden_size, hidden_size), jnp.float32,
                              -scale, scale)
    b_ih = jax.random.uniform(k_bih, (3 * hidden_size,), jnp.float32, -scale, scale)
    b_hh = jax.random.uniform(k_bhh, (3 * hidden_size,), jnp.float32, -scale, scale)

    token_ids = jax.random.randint(k_ids, (batch_size, seq_len), 0, vocab_size,
                                   dtype=jnp.int32)

    # time_block=8, batch_block=2 exercises both the time-chunk pipeline and
    # the parallel batch-block axis (grid = (2, 2)).
    annotations, hidden = gru_encoder_forward(
        token_ids, embedding, w_ih, w_hh, b_ih, b_hh,
        time_block=8, batch_block=2)
    jax.block_until_ready((annotations, hidden))

    ann_ref, hid_ref = _reference_forward(
        token_ids, embedding, w_ih, w_hh, b_ih, b_hh)

    assert annotations.shape == (batch_size, seq_len, hidden_size)
    assert hidden.shape == (batch_size, hidden_size)
    assert jnp.allclose(annotations, ann_ref, atol=2e-5, rtol=1e-5)
    assert jnp.allclose(hidden, hid_ref, atol=2e-5, rtol=1e-5)

    print("KERNEL_OK")
</pallas_src>

<mosaic_0001>
module attributes {stable_mosaic.version = 11 : i64} {
  func.func @_gru_encoder_kernel(%arg0: i32, %arg1: i32, %arg2: memref<2x8x32xf32, #tpu.memory_space<vmem>>, %arg3: memref<3x32x32xf32, #tpu.memory_space<vmem>>, %arg4: memref<3x32x32xf32, #tpu.memory_space<vmem>>, %arg5: memref<3x1x32xf32, #tpu.memory_space<vmem>>, %arg6: memref<1x32xf32, #tpu.memory_space<vmem>>, %arg7: memref<2x8x32xf32, #tpu.memory_space<vmem>>, %arg8: memref<1x2x32xf32, #tpu.memory_space<vmem>>, %arg9: memref<2x32xf32, #tpu.memory_space<vmem>>) attributes {dimension_semantics = [#tpu.dimension_semantics<parallel>, #tpu.dimension_semantics<arbitrary>], iteration_bounds = array<i64: 2, 2>, scalar_prefetch = 0 : i64, scratch_operands = 1 : i64, tpu.core_type = #tpu.core_type<tc>, window_params = [{transform_indices = @transform_0, window_bounds = array<i64: 2, 8, 32>}, {pipeline_mode = #tpu.pipeline_mode<synchronous>, transform_indices = @transform_1, window_bounds = array<i64: 3, 32, 32>}, {pipeline_mode = #tpu.pipeline_mode<synchronous>, transform_indices = @transform_2, window_bounds = array<i64: 3, 32, 32>}, {pipeline_mode = #tpu.pipeline_mode<synchronous>, transform_indices = @transform_3, window_bounds = array<i64: 3, 1, 32>}, {pipeline_mode = #tpu.pipeline_mode<synchronous>, transform_indices = @transform_4, window_bounds = array<i64: 1, 32>}, {transform_indices = @transform_5, window_bounds = array<i64: 2, 8, 32>}, {transform_indices = @transform_6, window_bounds = array<i64: 1, 2, 32>}]} {
    %c0_i32 = arith.constant 0 : i32
    %0 = arith.cmpi eq, %arg1, %c0_i32 : i32
    %1 = arith.extui %0 : i1 to i32
    %c0_i32_0 = arith.constant 0 : i32
    %2 = arith.cmpi ne, %1, %c0_i32_0 : i32
    scf.if %2 {
      %cst_104 = arith.constant 0.000000e+00 : f32
      %313 = vector.broadcast %cst_104 : f32 to vector<2x32xf32>
      %c0_105 = arith.constant 0 : index
      %c0_106 = arith.constant 0 : index
      %314 = vector.load %arg9[%c0_105, %c0_106] : memref<2x32xf32, #tpu.memory_space<vmem>>, vector<2x32xf32>
      tpu.vector_store %arg9[%c0_105, %c0_106], %313 {strides = array<i32>} : memref<2x32xf32, #tpu.memory_space<vmem>>, vector<2x32xf32>,
    } else {
    }
    %c0 = arith.constant 0 : index
    %c0_1 = arith.constant 0 : index
    %c0_2 = arith.constant 0 : index
    %3 = vector.load %arg2[%c0, %c0_1, %c0_2] : memref<2x8x32xf32, #tpu.memory_space<vmem>>, vector<2x8x32xf32>
    %4 = vector.shape_cast %3 : vector<2x8x32xf32> to vector<16x32xf32>
    %c0_3 = arith.constant 0 : index
    %c0_4 = arith.constant 0 : index
    %c0_5 = arith.constant 0 : index
    %5 = vector.load %arg3[%c0_3, %c0_4, %c0_5] : memref<3x32x32xf32, #tpu.memory_space<vmem>>, vector<1x32x32xf32>
    %6 = vector.shape_cast %5 : vector<1x32x32xf32> to vector<32x32xf32>
    %cst = arith.constant dense<0.000000e+00> : vector<16x32xf32>
    %7 = tpu.matmul %4, %6, %cst {dimension_numbers = #tpu.dot_dimension_numbers<[1], [0], [0], [1], [0, 0, 1, 1], [], []>} : vector<16x32xf32>, vector<32x32xf32>, vector<16x32xf32> -> vector<16x32xf32>
    %c0_6 = arith.constant 0 : index
    %c0_7 = arith.constant 0 : index
    %c0_8 = arith.constant 0 : index
    %8 = vector.load %arg5[%c0_6, %c0_7, %c0_8] : memref<3x1x32xf32, #tpu.memory_space<vmem>>, vector<1x1x32xf32>
    %9 = vector.shape_cast %8 : vector<1x1x32xf32> to vector<1x32xf32>
    %10 = vector.broadcast %9 : vector<1x32xf32> to vector<16x32xf32>
    %11 = arith.addf %7, %10 : vector<16x32xf32>
    %12 = vector.shape_cast %11 : vector<16x32xf32> to vector<2x8x32xf32>
    %c1 = arith.constant 1 : index
    %c0_9 = arith.constant 0 : index
    %c0_10 = arith.constant 0 : index
    %13 = vector.load %arg3[%c1, %c0_9, %c0_10] : memref<3x32x32xf32, #tpu.memory_space<vmem>>, vector<1x32x32xf32>
    %14 = vector.shape_cast %13 : vector<1x32x32xf32> to vector<32x32xf32>
    %cst_11 = arith.constant dense<0.000000e+00> : vector<16x32xf32>
    %15 = tpu.matmul %4, %14, %cst_11 {dimension_numbers = #tpu.dot_dimension_numbers<[1], [0], [0], [1], [0, 0, 1, 1], [], []>} : vector<16x32xf32>, vector<32x32xf32>, vector<16x32xf32> -> vector<16x32xf32>
    %c1_12 = arith.constant 1 : index
    %c0_13 = arith.constant 0 : index
    %c0_14 = arith.constant 0 : index
    %16 = vector.load %arg5[%c1_12, %c0_13, %c0_14] : memref<3x1x32xf32, #tpu.memory_space<vmem>>, vector<1x1x32xf32>
    %17 = vector.shape_cast %16 : vector<1x1x32xf32> to vector<1x32xf32>
    %18 = vector.broadcast %17 : vector<1x32xf32> to vector<16x32xf32>
    %19 = arith.addf %15, %18 : vector<16x32xf32>
    %20 = vector.shape_cast %19 : vector<16x32xf32> to vector<2x8x32xf32>
    %c2 = arith.constant 2 : index
    %c0_15 = arith.constant 0 : index
    %c0_16 = arith.constant 0 : index
    %21 = vector.load %arg3[%c2, %c0_15, %c0_16] : memref<3x32x32xf32, #tpu.memory_space<vmem>>, vector<1x32x32xf32>
    %22 = vector.shape_cast %21 : vector<1x32x32xf32> to vector<32x32xf32>
    %cst_17 = arith.constant dense<0.000000e+00> : vector<16x32xf32>
    %23 = tpu.matmul %4, %22, %cst_17 {dimension_numbers = #tpu.dot_dimension_numbers<[1], [0], [0], [1], [0, 0, 1, 1], [], []>} : vector<16x32xf32>, vector<32x32xf32>, vector<16x32xf32> -> vector<16x32xf32>
    %c2_18 = arith.constant 2 : index
    %c0_19 = arith.constant 0 : index
    %c0_20 = arith.constant 0 : index
    %24 = vector.load %arg5[%c2_18, %c0_19, %c0_20] : memref<3x1x32xf32, #tpu.memory_space<vmem>>, vector<1x1x32xf32>
    %25 = vector.shape_cast %24 : vector<1x1x32xf32> to vector<1x32xf32>
    %26 = vector.broadcast %25 : vector<1x32xf32> to vector<16x32xf32>
    %27 = arith.addf %23, %26 : vector<16x32xf32>
    %28 = vector.shape_cast %27 : vector<16x32xf32> to vector<2x8x32xf32>
    %c0_21 = arith.constant 0 : index
    %c0_22 = arith.constant 0 : index
    %c0_23 = arith.constant 0 : index
    %29 = vector.load %arg4[%c0_21, %c0_22, %c0_23] : memref<3x32x32xf32, #tpu.memory_space<vmem>>, vector<1x32x32xf32>
    %30 = vector.shape_cast %29 : vector<1x32x32xf32> to vector<32x32xf32>
    %c1_24 = arith.constant 1 : index
    %c0_25 = arith.constant 0 : index
    %c0_26 = arith.constant 0 : index
    %31 = vector.load %arg4[%c1_24, %c0_25, %c0_26] : memref<3x32x32xf32, #tpu.memory_space<vmem>>, vector<1x32x32xf32>
    %32 = vector.shape_cast %31 : vector<1x32x32xf32> to vector<32x32xf32>
    %c2_27 = arith.constant 2 : index
    %c0_28 = arith.constant 0 : index
    %c0_29 = arith.constant 0 : index
    %33 = vector.load %arg4[%c2_27, %c0_28, %c0_29] : memref<3x32x32xf32, #tpu.memory_space<vmem>>, vector<1x32x32xf32>
    %34 = vector.shape_cast %33 : vector<1x32x32xf32> to vector<32x32xf32>
    %c0_30 = arith.constant 0 : index
    %c0_31 = arith.constant 0 : index
    %35 = vector.load %arg6[%c0_30, %c0_31] : memref<1x32xf32, #tpu.memory_space<vmem>>, vector<1x32xf32>
    %c0_32 = arith.constant 0 : index
    %c0_33 = arith.constant 0 : index
    %36 = vector.load %arg9[%c0_32, %c0_33] : memref<2x32xf32, #tpu.memory_space<vmem>>, vector<2x32xf32>
    %cst_34 = arith.constant dense<0.000000e+00> : vector<2x32xf32>
    %37 = tpu.matmul %36, %30, %cst_34 {dimension_numbers = #tpu.dot_dimension_numbers<[1], [0], [0], [1], [0, 0, 1, 1], [], []>} : vector<2x32xf32>, vector<32x32xf32>, vector<2x32xf32> -> vector<2x32xf32>
    %cst_35 = arith.constant dense<0.000000e+00> : vector<2x32xf32>
    %38 = tpu.matmul %36, %32, %cst_35 {dimension_numbers = #tpu.dot_dimension_numbers<[1], [0], [0], [1], [0, 0, 1, 1], [], []>} : vector<2x32xf32>, vector<32x32xf32>, vector<2x32xf32> -> vector<2x32xf32>
    %cst_36 = arith.constant dense<0.000000e+00> : vector<2x32xf32>
    %39 = tpu.matmul %36, %34, %cst_36 {dimension_numbers = #tpu.dot_dimension_numbers<[1], [0], [0], [1], [0, 0, 1, 1], [], []>} : vector<2x32xf32>, vector<32x32xf32>, vector<2x32xf32> -> vector<2x32xf32>
    %40 = vector.broadcast %35 : vector<1x32xf32> to vector<2x32xf32>
    %41 = arith.addf %39, %40 : vector<2x32xf32>
    %42 = vector.extract_strided_slice %12 {offsets = [0, 0, 0], sizes = [2, 1, 32], strides = [1, 1, 1]} : vector<2x8x32xf32> to vector<2x1x32xf32>
    %43 = vector.shape_cast %42 : vector<2x1x32xf32> to vector<2x32xf32>
    %44 = arith.addf %43, %37 : vector<2x32xf32>
    %45 = arith.negf %44 : vector<2x32xf32>
    %46 = math.exp %45 : vector<2x32xf32>
    %cst_37 = arith.constant 1.000000e+00 : f32
    %47 = vector.broadcast %cst_37 : f32 to vector<2x32xf32>
    %48 = arith.addf %47, %46 : vector<2x32xf32>
    %49 = arith.divf %47, %48 : vector<2x32xf32>
    %50 = vector.extract_strided_slice %20 {offsets = [0, 0, 0], sizes = [2, 1, 32], strides = [1, 1, 1]} : vector<2x8x32xf32> to vector<2x1x32xf32>
    %51 = vector.shape_cast %50 : vector<2x1x32xf32> to vector<2x32xf32>
    %52 = arith.addf %51, %38 : vector<2x32xf32>
    %53 = arith.negf %52 : vector<2x32xf32>
    %54 = math.exp %53 : vector<2x32xf32>
    %cst_38 = arith.constant 1.000000e+00 : f32
    %55 = vector.broadcast %cst_38 : f32 to vector<2x32xf32>
    %56 = arith.addf %55, %54 : vector<2x32xf32>
    %57 = arith.divf %55, %56 : vector<2x32xf32>
    %58 = vector.extract_strided_slice %28 {offsets = [0, 0, 0], sizes = [2, 1, 32], strides = [1, 1, 1]} : vector<2x8x32xf32> to vector<2x1x32xf32>
    %59 = vector.shape_cast %58 : vector<2x1x32xf32> to vector<2x32xf32>
    %60 = arith.mulf %49, %41 : vector<2x32xf32>
    %61 = arith.addf %59, %60 : vector<2x32xf32>
    %62 = math.tanh %61 : vector<2x32xf32>
    %cst_39 = arith.constant 1.000000e+00 : f32
    %63 = vector.broadcast %cst_39 : f32 to vector<2x32xf32>
    %64 = arith.subf %63, %57 : vector<2x32xf32>
    %65 = arith.mulf %64, %62 : vector<2x32xf32>
    %66 = arith.mulf %57, %36 : vector<2x32xf32>
    %67 = arith.addf %65, %66 : vector<2x32xf32>
    %c0_40 = arith.constant 0 : index
    %c0_41 = arith.constant 0 : index
    %c0_42 = arith.constant 0 : index
    %68 = vector.load %arg7[%c0_40, %c0_41, %c0_42] : memref<2x8x32xf32, #tpu.memory_space<vmem>>, vector<2x1x32xf32>
    %69 = vector.shape_cast %68 : vector<2x1x32xf32> to vector<2x32xf32>
    %70 = vector.shape_cast %67 : vector<2x32xf32> to vector<2x1x32xf32>
    tpu.vector_store %arg7[%c0_40, %c0_41, %c0_42], %70 {strides = array<i32>} : memref<2x8x32xf32, #tpu.memory_space<vmem>>, vector<2x1x32xf32>,
    %cst_43 = arith.constant dense<0.000000e+00> : vector<2x32xf32>
    %71 = tpu.matmul %67, %30, %cst_43 {dimension_numbers = #tpu.dot_dimension_numbers<[1], [0], [0], [1], [0, 0, 1, 1], [], []>} : vector<2x32xf32>, vector<32x32xf32>, vector<2x32xf32> -> vector<2x32xf32>
    %cst_44 = arith.constant dense<0.000000e+00> : vector<2x32xf32>
    %72 = tpu.matmul %67, %32, %cst_44 {dimension_numbers = #tpu.dot_dimension_numbers<[1], [0], [0], [1], [0, 0, 1, 1], [], []>} : vector<2x32xf32>, vector<32x32xf32>, vector<2x32xf32> -> vector<2x32xf32>
    %cst_45 = arith.constant dense<0.000000e+00> : vector<2x32xf32>
    %73 = tpu.matmul %67, %34, %cst_45 {dimension_numbers = #tpu.dot_dimension_numbers<[1], [0], [0], [1], [0, 0, 1, 1], [], []>} : vector<2x32xf32>, vector<32x32xf32>, vector<2x32xf32> -> vector<2x32xf32>
    %74 = vector.broadcast %35 : vector<1x32xf32> to vector<2x32xf32>
    %75 = arith.addf %73, %74 : vector<2x32xf32>
    %76 = vector.extract_strided_slice %12 {offsets = [0, 1, 0], sizes = [2, 1, 32], strides = [1, 1, 1]} : vector<2x8x32xf32> to vector<2x1x32xf32>
    %77 = vector.shape_cast %76 : vector<2x1x32xf32> to vector<2x32xf32>
    %78 = arith.addf %77, %71 : vector<2x32xf32>
    %79 = arith.negf %78 : vector<2x32xf32>
    %80 = math.exp %79 : vector<2x32xf32>
    %cst_46 = arith.constant 1.000000e+00 : f32
    %81 = vector.broadcast %cst_46 : f32 to vector<2x32xf32>
    %82 = arith.addf %81, %80 : vector<2x32xf32>
    %83 = arith.divf %81, %82 : vector<2x32xf32>
    %84 = vector.extract_strided_slice %20 {offsets = [0, 1, 0], sizes = [2, 1, 32], strides = [1, 1, 1]} : vector<2x8x32xf32> to vector<2x1x32xf32>
    %85 = vector.shape_cast %84 : vector<2x1x32xf32> to vector<2x32xf32>
    %86 = arith.addf %85, %72 : vector<2x32xf32>
    %87 = arith.negf %86 : vector<2x32xf32>
    %88 = math.exp %87 : vector<2x32xf32>
    %cst_47 = arith.constant 1.000000e+00 : f32
    %89 = vector.broadcast %cst_47 : f32 to vector<2x32xf32>
    %90 = arith.addf %89, %88 : vector<2x32xf32>
    %91 = arith.divf %89, %90 : vector<2x32xf32>
    %92 = vector.extract_strided_slice %28 {offsets = [0, 1, 0], sizes = [2, 1, 32], strides = [1, 1, 1]} : vector<2x8x32xf32> to vector<2x1x32xf32>
    %93 = vector.shape_cast %92 : vector<2x1x32xf32> to vector<2x32xf32>
    %94 = arith.mulf %83, %75 : vector<2x32xf32>
    %95 = arith.addf %93, %94 : vector<2x32xf32>
    %96 = math.tanh %95 : vector<2x32xf32>
    %cst_48 = arith.constant 1.000000e+00 : f32
    %97 = vector.broadcast %cst_48 : f32 to vector<2x32xf32>
    %98 = arith.subf %97, %91 : vector<2x32xf32>
    %99 = arith.mulf %98, %96 : vector<2x32xf32>
    %100 = arith.mulf %91, %67 : vector<2x32xf32>
    %101 = arith.addf %99, %100 : vector<2x32xf32>
    %c0_49 = arith.constant 0 : index
    %c1_50 = arith.constant 1 : index
    %c0_51 = arith.constant 0 : index
    %102 = vector.load %arg7[%c0_49, %c1_50, %c0_51] : memref<2x8x32xf32, #tpu.memory_space<vmem>>, vector<2x1x32xf32>
    %103 = vector.shape_cast %102 : vector<2x1x32xf32> to vector<2x32xf32>
    %104 = vector.shape_cast %101 : vector<2x32xf32> to vector<2x1x32xf32>
    tpu.vector_store %arg7[%c0_49, %c1_50, %c0_51], %104 {strides = array<i32>} : memref<2x8x32xf32, #tpu.memory_space<vmem>>, vector<2x1x32xf32>,
    %cst_52 = arith.constant dense<0.000000e+00> : vector<2x32xf32>
    %105 = tpu.matmul %101, %30, %cst_52 {dimension_numbers = #tpu.dot_dimension_numbers<[1], [0], [0], [1], [0, 0, 1, 1], [], []>} : vector<2x32xf32>, vector<32x32xf32>, vector<2x32xf32> -> vector<2x32xf32>
    %cst_53 = arith.constant dense<0.000000e+00> : vector<2x32xf32>
    %106 = tpu.matmul %101, %32, %cst_53 {dimension_numbers = #tpu.dot_dimension_numbers<[1], [0], [0], [1], [0, 0, 1, 1], [], []>} : vector<2x32xf32>, vector<32x32xf32>, vector<2x32xf32> -> vector<2x32xf32>
    %cst_54 = arith.constant dense<0.000000e+00> : vector<2x32xf32>
    %107 = tpu.matmul %101, %34, %cst_54 {dimension_numbers = #tpu.dot_dimension_numbers<[1], [0], [0], [1], [0, 0, 1, 1], [], []>} : vector<2x32xf32>, vector<32x32xf32>, vector<2x32xf32> -> vector<2x32xf32>
    %108 = vector.broadcast %35 : vector<1x32xf32> to vector<2x32xf32>
    %109 = arith.addf %107, %108 : vector<2x32xf32>
    %110 = vector.extract_strided_slice %12 {offsets = [0, 2, 0], sizes = [2, 1, 32], strides = [1, 1, 1]} : vector<2x8x32xf32> to vector<2x1x32xf32>
    %111 = vector.shape_cast %110 : vector<2x1x32xf32> to vector<2x32xf32>
    %112 = arith.addf %111, %105 : vector<2x32xf32>
    %113 = arith.negf %112 : vector<2x32xf32>
    %114 = math.exp %113 : vector<2x32xf32>
    %cst_55 = arith.constant 1.000000e+00 : f32
    %115 = vector.broadcast %cst_55 : f32 to vector<2x32xf32>
    %116 = arith.addf %115, %114 : vector<2x32xf32>
    %117 = arith.divf %115, %116 : vector<2x32xf32>
    %118 = vector.extract_strided_slice %20 {offsets = [0, 2, 0], sizes = [2, 1, 32], strides = [1, 1, 1]} : vector<2x8x32xf32> to vector<2x1x32xf32>
    %119 = vector.shape_cast %118 : vector<2x1x32xf32> to vector<2x32xf32>
    %120 = arith.addf %119, %106 : vector<2x32xf32>
    %121 = arith.negf %120 : vector<2x32xf32>
    %122 = math.exp %121 : vector<2x32xf32>
    %cst_56 = arith.constant 1.000000e+00 : f32
    %123 = vector.broadcast %cst_56 : f32 to vector<2x32xf32>
    %124 = arith.addf %123, %122 : vector<2x32xf32>
    %125 = arith.divf %123, %124 : vector<2x32xf32>
    %126 = vector.extract_strided_slice %28 {offsets = [0, 2, 0], sizes = [2, 1, 32], strides = [1, 1, 1]} : vector<2x8x32xf32> to vector<2x1x32xf32>
    %127 = vector.shape_cast %126 : vector<2x1x32xf32> to vector<2x32xf32>
    %128 = arith.mulf %117, %109 : vector<2x32xf32>
    %129 = arith.addf %127, %128 : vector<2x32xf32>
    %130 = math.tanh %129 : vector<2x32xf32>
    %cst_57 = arith.constant 1.000000e+00 : f32
    %131 = vector.broadcast %cst_57 : f32 to vector<2x32xf32>
    %132 = arith.subf %131, %125 : vector<2x32xf32>
    %133 = arith.mulf %132, %130 : vector<2x32xf32>
    %134 = arith.mulf %125, %101 : vector<2x32xf32>
    %135 = arith.addf %133, %134 : vector<2x32xf32>
    %c0_58 = arith.constant 0 : index
    %c2_59 = arith.constant 2 : index
    %c0_60 = arith.constant 0 : index
    %136 = vector.load %arg7[%c0_58, %c2_59, %c0_60] : memref<2x8x32xf32, #tpu.memory_space<vmem>>, vector<2x1x32xf32>
    %137 = vector.shape_cast %136 : vector<2x1x32xf32> to vector<2x32xf32>
    %138 = vector.shape_cast %135 : vector<2x32xf32> to vector<2x1x32xf32>
    tpu.vector_store %arg7[%c0_58, %c2_59, %c0_60], %138 {strides = array<i32>} : memref<2x8x32xf32, #tpu.memory_space<vmem>>, vector<2x1x32xf32>,
    %cst_61 = arith.constant dense<0.000000e+00> : vector<2x32xf32>
    %139 = tpu.matmul %135, %30, %cst_61 {dimension_numbers = #tpu.dot_dimension_numbers<[1], [0], [0], [1], [0, 0, 1, 1], [], []>} : vector<2x32xf32>, vector<32x32xf32>, vector<2x32xf32> -> vector<2x32xf32>
    %cst_62 = arith.constant dense<0.000000e+00> : vector<2x32xf32>
    %140 = tpu.matmul %135, %32, %cst_62 {dimension_numbers = #tpu.dot_dimension_numbers<[1], [0], [0], [1], [0, 0, 1, 1], [], []>} : vector<2x32xf32>, vector<32x32xf32>, vector<2x32xf32> -> vector<2x32xf32>
    %cst_63 = arith.constant dense<0.000000e+00> : vector<2x32xf32>
    %141 = tpu.matmul %135, %34, %cst_63 {dimension_numbers = #tpu.dot_dimension_numbers<[1], [0], [0], [1], [0, 0, 1, 1], [], []>} : vector<2x32xf32>, vector<32x32xf32>, vector<2x32xf32> -> vector<2x32xf32>
    %142 = vector.broadcast %35 : vector<1x32xf32> to vector<2x32xf32>
    %143 = arith.addf %141, %142 : vector<2x32xf32>
    %144 = vector.extract_strided_slice %12 {offsets = [0, 3, 0], sizes = [2, 1, 32], strides = [1, 1, 1]} : vector<2x8x32xf32> to vector<2x1x32xf32>
    %145 = vector.shape_cast %144 : vector<2x1x32xf32> to vector<2x32xf32>
    %146 = arith.addf %145, %139 : vector<2x32xf32>
    %147 = arith.negf %146 : vector<2x32xf32>
    %148 = math.exp %147 : vector<2x32xf32>
    %cst_64 = arith.constant 1.000000e+00 : f32
    %149 = vector.broadcast %cst_64 : f32 to vector<2x32xf32>
    %150 = arith.addf %149, %148 : vector<2x32xf32>
    %151 = arith.divf %149, %150 : vector<2x32xf32>
    %152 = vector.extract_strided_slice %20 {offsets = [0, 3, 0], sizes = [2, 1, 32], strides = [1, 1, 1]} : vector<2x8x32xf32> to vector<2x1x32xf32>
    %153 = vector.shape_cast %152 : vector<2x1x32xf32> to vector<2x32xf32>
    %154 = arith.addf %153, %140 : vector<2x32xf32>
    %155 = arith.negf %154 : vector<2x32xf32>
    %156 = math.exp %155 : vector<2x32xf32>
    %cst_65 = arith.constant 1.000000e+00 : f32
    %157 = vector.broadcast %cst_65 : f32 to vector<2x32xf32>
    %158 = arith.addf %157, %156 : vector<2x32xf32>
    %159 = arith.divf %157, %158 : vector<2x32xf32>
    %160 = vector.extract_strided_slice %28 {offsets = [0, 3, 0], sizes = [2, 1, 32], strides = [1, 1, 1]} : vector<2x8x32xf32> to vector<2x1x32xf32>
    %161 = vector.shape_cast %160 : vector<2x1x32xf32> to vector<2x32xf32>
    %162 = arith.mulf %151, %143 : vector<2x32xf32>
    %163 = arith.addf %161, %162 : vector<2x32xf32>
    %164 = math.tanh %163 : vector<2x32xf32>
    %cst_66 = arith.constant 1.000000e+00 : f32
    %165 = vector.broadcast %cst_66 : f32 to vector<2x32xf32>
    %166 = arith.subf %165, %159 : vector<2x32xf32>
    %167 = arith.mulf %166, %164 : vector<2x32xf32>
    %168 = arith.mulf %159, %135 : vector<2x32xf32>
    %169 = arith.addf %167, %168 : vector<2x32xf32>
    %c0_67 = arith.constant 0 : index
    %c3 = arith.constant 3 : index
    %c0_68 = arith.constant 0 : index
    %170 = vector.load %arg7[%c0_67, %c3, %c0_68] : memref<2x8x32xf32, #tpu.memory_space<vmem>>, vector<2x1x32xf32>
    %171 = vector.shape_cast %170 : vector<2x1x32xf32> to vector<2x32xf32>
    %172 = vector.shape_cast %169 : vector<2x32xf32> to vector<2x1x32xf32>
    tpu.vector_store %arg7[%c0_67, %c3, %c0_68], %172 {strides = array<i32>} : memref<2x8x32xf32, #tpu.memory_space<vmem>>, vector<2x1x32xf32>,
    %cst_69 = arith.constant dense<0.000000e+00> : vector<2x32xf32>
    %173 = tpu.matmul %169, %30, %cst_69 {dimension_numbers = #tpu.dot_dimension_numbers<[1], [0], [0], [1], [0, 0, 1, 1], [], []>} : vector<2x32xf32>, vector<32x32xf32>, vector<2x32xf32> -> vector<2x32xf32>
    %cst_70 = arith.constant dense<0.000000e+00> : vector<2x32xf32>
    %174 = tpu.matmul %169, %32, %cst_70 {dimension_numbers = #tpu.dot_dimension_numbers<[1], [0], [0], [1], [0, 0, 1, 1], [], []>} : vector<2x32xf32>, vector<32x32xf32>, vector<2x32xf32> -> vector<2x32xf32>
    %cst_71 = arith.constant dense<0.000000e+00> : vector<2x32xf32>
    %175 = tpu.matmul %169, %34, %cst_71 {dimension_numbers = #tpu.dot_dimension_numbers<[1], [0], [0], [1], [0, 0, 1, 1], [], []>} : vector<2x32xf32>, vector<32x32xf32>, vector<2x32xf32> -> vector<2x32xf32>
    %176 = vector.broadcast %35 : vector<1x32xf32> to vector<2x32xf32>
    %177 = arith.addf %175, %176 : vector<2x32xf32>
    %178 = vector.extract_strided_slice %12 {offsets = [0, 4, 0], sizes = [2, 1, 32], strides = [1, 1, 1]} : vector<2x8x32xf32> to vector<2x1x32xf32>
    %179 = vector.shape_cast %178 : vector<2x1x32xf32> to vector<2x32xf32>
    %180 = arith.addf %179, %173 : vector<2x32xf32>
    %181 = arith.negf %180 : vector<2x32xf32>
    %182 = math.exp %181 : vector<2x32xf32>
    %cst_72 = arith.constant 1.000000e+00 : f32
    %183 = vector.broadcast %cst_72 : f32 to vector<2x32xf32>
    %184 = arith.addf %183, %182 : vector<2x32xf32>
    %185 = arith.divf %183, %184 : vector<2x32xf32>
    %186 = vector.extract_strided_slice %20 {offsets = [0, 4, 0], sizes = [2, 1, 32], strides = [1, 1, 1]} : vector<2x8x32xf32> to vector<2x1x32xf32>
    %187 = vector.shape_cast %186 : vector<2x1x32xf32> to vector<2x32xf32>
    %188 = arith.addf %187, %174 : vector<2x32xf32>
    %189 = arith.negf %188 : vector<2x32xf32>
    %190 = math.exp %189 : vector<2x32xf32>
    %cst_73 = arith.constant 1.000000e+00 : f32
    %191 = vector.broadcast %cst_73 : f32 to vector<2x32xf32>
    %192 = arith.addf %191, %190 : vector<2x32xf32>
    %193 = arith.divf %191, %192 : vector<2x32xf32>
    %194 = vector.extract_strided_slice %28 {offsets = [0, 4, 0], sizes = [2, 1, 32], strides = [1, 1, 1]} : vector<2x8x32xf32> to vector<2x1x32xf32>
    %195 = vector.shape_cast %194 : vector<2x1x32xf32> to vector<2x32xf32>
    %196 = arith.mulf %185, %177 : vector<2x32xf32>
    %197 = arith.addf %195, %196 : vector<2x32xf32>
    %198 = math.tanh %197 : vector<2x32xf32>
    %cst_74 = arith.constant 1.000000e+00 : f32
    %199 = vector.broadcast %cst_74 : f32 to vector<2x32xf32>
    %200 = arith.subf %199, %193 : vector<2x32xf32>
    %201 = arith.mulf %200, %198 : vector<2x32xf32>
    %202 = arith.mulf %193, %169 : vector<2x32xf32>
    %203 = arith.addf %201, %202 : vector<2x32xf32>
    %c0_75 = arith.constant 0 : index
    %c4 = arith.constant 4 : index
    %c0_76 = arith.constant 0 : index
    %204 = vector.load %arg7[%c0_75, %c4, %c0_76] : memref<2x8x32xf32, #tpu.memory_space<vmem>>, vector<2x1x32xf32>
    %205 = vector.shape_cast %204 : vector<2x1x32xf32> to vector<2x32xf32>
    %206 = vector.shape_cast %203 : vector<2x32xf32> to vector<2x1x32xf32>
    tpu.vector_store %arg7[%c0_75, %c4, %c0_76], %206 {strides = array<i32>} : memref<2x8x32xf32, #tpu.memory_space<vmem>>, vector<2x1x32xf32>,
    %cst_77 = arith.constant dense<0.000000e+00> : vector<2x32xf32>
    %207 = tpu.matmul %203, %30, %cst_77 {dimension_numbers = #tpu.dot_dimension_numbers<[1], [0], [0], [1], [0, 0, 1, 1], [], []>} : vector<2x32xf32>, vector<32x32xf32>, vector<2x32xf32> -> vector<2x32xf32>
    %cst_78 = arith.constant dense<0.000000e+00> : vector<2x32xf32>
    %208 = tpu.matmul %203, %32, %cst_78 {dimension_numbers = #tpu.dot_dimension_numbers<[1], [0], [0], [1], [0, 0, 1, 1], [], []>} : vector<2x32xf32>, vector<32x32xf32>, vector<2x32xf32> -> vector<2x32xf32>
    %cst_79 = arith.constant dense<0.000000e+00> : vector<2x32xf32>
    %209 = tpu.matmul %203, %34, %cst_79 {dimension_numbers = #tpu.dot_dimension_numbers<[1], [0], [0], [1], [0, 0, 1, 1], [], []>} : vector<2x32xf32>, vector<32x32xf32>, vector<2x32xf32> -> vector<2x32xf32>
    %210 = vector.broadcast %35 : vector<1x32xf32> to vector<2x32xf32>
    %211 = arith.addf %209, %210 : vector<2x32xf32>
    %212 = vector.extract_strided_slice %12 {offsets = [0, 5, 0], sizes = [2, 1, 32], strides = [1, 1, 1]} : vector<2x8x32xf32> to vector<2x1x32xf32>
    %213 = vector.shape_cast %212 : vector<2x1x32xf32> to vector<2x32xf32>
    %214 = arith.addf %213, %207 : vector<2x32xf32>
    %215 = arith.negf %214 : vector<2x32xf32>
    %216 = math.exp %215 : vector<2x32xf32>
    %cst_80 = arith.constant 1.000000e+00 : f32
    %217 = vector.broadcast %cst_80 : f32 to vector<2x32xf32>
    %218 = arith.addf %217, %216 : vector<2x32xf32>
    %219 = arith.divf %217, %218 : vector<2x32xf32>
    %220 = vector.extract_strided_slice %20 {offsets = [0, 5, 0], sizes = [2, 1, 32], strides = [1, 1, 1]} : vector<2x8x32xf32> to vector<2x1x32xf32>
    %221 = vector.shape_cast %220 : vector<2x1x32xf32> to vector<2x32xf32>
    %222 = arith.addf %221, %208 : vector<2x32xf32>
    %223 = arith.negf %222 : vector<2x32xf32>
    %224 = math.exp %223 : vector<2x32xf32>
    %cst_81 = arith.constant 1.000000e+00 : f32
    %225 = vector.broadcast %cst_81 : f32 to vector<2x32xf32>
    %226 = arith.addf %225, %224 : vector<2x32xf32>
    %227 = arith.divf %225, %226 : vector<2x32xf32>
    %228 = vector.extract_strided_slice %28 {offsets = [0, 5, 0], sizes = [2, 1, 32], strides = [1, 1, 1]} : vector<2x8x32xf32> to vector<2x1x32xf32>
    %229 = vector.shape_cast %228 : vector<2x1x32xf32> to vector<2x32xf32>
    %230 = arith.mulf %219, %211 : vector<2x32xf32>
    %231 = arith.addf %229, %230 : vector<2x32xf32>
    %232 = math.tanh %231 : vector<2x32xf32>
    %cst_82 = arith.constant 1.000000e+00 : f32
    %233 = vector.broadcast %cst_82 : f32 to vector<2x32xf32>
    %234 = arith.subf %233, %227 : vector<2x32xf32>
    %235 = arith.mulf %234, %232 : vector<2x32xf32>
    %236 = arith.mulf %227, %203 : vector<2x32xf32>
    %237 = arith.addf %235, %236 : vector<2x32xf32>
    %c0_83 = arith.constant 0 : index
    %c5 = arith.constant 5 : index
    %c0_84 = arith.constant 0 : index
    %238 = vector.load %arg7[%c0_83, %c5, %c0_84] : memref<2x8x32xf32, #tpu.memory_space<vmem>>, vector<2x1x32xf32>
    %239 = vector.shape_cast %238 : vector<2x1x32xf32> to vector<2x32xf32>
    %240 = vector.shape_cast %237 : vector<2x32xf32> to vector<2x1x32xf32>
    tpu.vector_store %arg7[%c0_83, %c5, %c0_84], %240 {strides = array<i32>} : memref<2x8x32xf32, #tpu.memory_space<vmem>>, vector<2x1x32xf32>,
    %cst_85 = arith.constant dense<0.000000e+00> : vector<2x32xf32>
    %241 = tpu.matmul %237, %30, %cst_85 {dimension_numbers = #tpu.dot_dimension_numbers<[1], [0], [0], [1], [0, 0, 1, 1], [], []>} : vector<2x32xf32>, vector<32x32xf32>, vector<2x32xf32> -> vector<2x32xf32>
    %cst_86 = arith.constant dense<0.000000e+00> : vector<2x32xf32>
    %242 = tpu.matmul %237, %32, %cst_86 {dimension_numbers = #tpu.dot_dimension_numbers<[1], [0], [0], [1], [0, 0, 1, 1], [], []>} : vector<2x32xf32>, vector<32x32xf32>, vector<2x32xf32> -> vector<2x32xf32>
    %cst_87 = arith.constant dense<0.000000e+00> : vector<2x32xf32>
    %243 = tpu.matmul %237, %34, %cst_87 {dimension_numbers = #tpu.dot_dimension_numbers<[1], [0], [0], [1], [0, 0, 1, 1], [], []>} : vector<2x32xf32>, vector<32x32xf32>, vector<2x32xf32> -> vector<2x32xf32>
    %244 = vector.broadcast %35 : vector<1x32xf32> to vector<2x32xf32>
    %245 = arith.addf %243, %244 : vector<2x32xf32>
    %246 = vector.extract_strided_slice %12 {offsets = [0, 6, 0], sizes = [2, 1, 32], strides = [1, 1, 1]} : vector<2x8x32xf32> to vector<2x1x32xf32>
    %247 = vector.shape_cast %246 : vector<2x1x32xf32> to vector<2x32xf32>
    %248 = arith.addf %247, %241 : vector<2x32xf32>
    %249 = arith.negf %248 : vector<2x32xf32>
    %250 = math.exp %249 : vector<2x32xf32>
    %cst_88 = arith.constant 1.000000e+00 : f32
    %251 = vector.broadcast %cst_88 : f32 to vector<2x32xf32>
    %252 = arith.addf %251, %250 : vector<2x32xf32>
    %253 = arith.divf %251, %252 : vector<2x32xf32>
    %254 = vector.extract_strided_slice %20 {offsets = [0, 6, 0], sizes = [2, 1, 32], strides = [1, 1, 1]} : vector<2x8x32xf32> to vector<2x1x32xf32>
    %255 = vector.shape_cast %254 : vector<2x1x32xf32> to vector<2x32xf32>
    %256 = arith.addf %255, %242 : vector<2x32xf32>
    %257 = arith.negf %256 : vector<2x32xf32>
    %258 = math.exp %257 : vector<2x32xf32>
    %cst_89 = arith.constant 1.000000e+00 : f32
    %259 = vector.broadcast %cst_89 : f32 to vector<2x32xf32>
    %260 = arith.addf %259, %258 : vector<2x32xf32>
    %261 = arith.divf %259, %260 : vector<2x32xf32>
    %262 = vector.extract_strided_slice %28 {offsets = [0, 6, 0], sizes = [2, 1, 32], strides = [1, 1, 1]} : vector<2x8x32xf32> to vector<2x1x32xf32>
    %263 = vector.shape_cast %262 : vector<2x1x32xf32> to vector<2x32xf32>
    %264 = arith.mulf %253, %245 : vector<2x32xf32>
    %265 = arith.addf %263, %264 : vector<2x32xf32>
    %266 = math.tanh %265 : vector<2x32xf32>
    %cst_90 = arith.constant 1.000000e+00 : f32
    %267 = vector.broadcast %cst_90 : f32 to vector<2x32xf32>
    %268 = arith.subf %267, %261 : vector<2x32xf32>
    %269 = arith.mulf %268, %266 : vector<2x32xf32>
    %270 = arith.mulf %261, %237 : vector<2x32xf32>
    %271 = arith.addf %269, %270 : vector<2x32xf32>
    %c0_91 = arith.constant 0 : index
    %c6 = arith.constant 6 : index
    %c0_92 = arith.constant 0 : index
    %272 = vector.load %arg7[%c0_91, %c6, %c0_92] : memref<2x8x32xf32, #tpu.memory_space<vmem>>, vector<2x1x32xf32>
    %273 = vector.shape_cast %272 : vector<2x1x32xf32> to vector<2x32xf32>
    %274 = vector.shape_cast %271 : vector<2x32xf32> to vector<2x1x32xf32>
    tpu.vector_store %arg7[%c0_91, %c6, %c0_92], %274 {strides = array<i32>} : memref<2x8x32xf32, #tpu.memory_space<vmem>>, vector<2x1x32xf32>,
    %cst_93 = arith.constant dense<0.000000e+00> : vector<2x32xf32>
    %275 = tpu.matmul %271, %30, %cst_93 {dimension_numbers = #tpu.dot_dimension_numbers<[1], [0], [0], [1], [0, 0, 1, 1], [], []>} : vector<2x32xf32>, vector<32x32xf32>, vector<2x32xf32> -> vector<2x32xf32>
    %cst_94 = arith.constant dense<0.000000e+00> : vector<2x32xf32>
    %276 = tpu.matmul %271, %32, %cst_94 {dimension_numbers = #tpu.dot_dimension_numbers<[1], [0], [0], [1], [0, 0, 1, 1], [], []>} : vector<2x32xf32>, vector<32x32xf32>, vector<2x32xf32> -> vector<2x32xf32>
    %cst_95 = arith.constant dense<0.000000e+00> : vector<2x32xf32>
    %277 = tpu.matmul %271, %34, %cst_95 {dimension_numbers = #tpu.dot_dimension_numbers<[1], [0], [0], [1], [0, 0, 1, 1], [], []>} : vector<2x32xf32>, vector<32x32xf32>, vector<2x32xf32> -> vector<2x32xf32>
    %278 = vector.broadcast %35 : vector<1x32xf32> to vector<2x32xf32>
    %279 = arith.addf %277, %278 : vector<2x32xf32>
    %280 = vector.extract_strided_slice %12 {offsets = [0, 7, 0], sizes = [2, 1, 32], strides = [1, 1, 1]} : vector<2x8x32xf32> to vector<2x1x32xf32>
    %281 = vector.shape_cast %280 : vector<2x1x32xf32> to vector<2x32xf32>
    %282 = arith.addf %281, %275 : vector<2x32xf32>
    %283 = arith.negf %282 : vector<2x32xf32>
    %284 = math.exp %283 : vector<2x32xf32>
    %cst_96 = arith.constant 1.000000e+00 : f32
    %285 = vector.broadcast %cst_96 : f32 to vector<2x32xf32>
    %286 = arith.addf %285, %284 : vector<2x32xf32>
    %287 = arith.divf %285, %286 : vector<2x32xf32>
    %288 = vector.extract_strided_slice %20 {offsets = [0, 7, 0], sizes = [2, 1, 32], strides = [1, 1, 1]} : vector<2x8x32xf32> to vector<2x1x32xf32>
    %289 = vector.shape_cast %288 : vector<2x1x32xf32> to vector<2x32xf32>
    %290 = arith.addf %289, %276 : vector<2x32xf32>
    %291 = arith.negf %290 : vector<2x32xf32>
    %292 = math.exp %291 : vector<2x32xf32>
    %cst_97 = arith.constant 1.000000e+00 : f32
    %293 = vector.broadcast %cst_97 : f32 to vector<2x32xf32>
    %294 = arith.addf %293, %292 : vector<2x32xf32>
    %295 = arith.divf %293, %294 : vector<2x32xf32>
    %296 = vector.extract_strided_slice %28 {offsets = [0, 7, 0], sizes = [2, 1, 32], strides = [1, 1, 1]} : vector<2x8x32xf32> to vector<2x1x32xf32>
    %297 = vector.shape_cast %296 : vector<2x1x32xf32> to vector<2x32xf32>
    %298 = arith.mulf %287, %279 : vector<2x32xf32>
    %299 = arith.addf %297, %298 : vector<2x32xf32>
    %300 = math.tanh %299 : vector<2x32xf32>
    %cst_98 = arith.constant 1.000000e+00 : f32
    %301 = vector.broadcast %cst_98 : f32 to vector<2x32xf32>
    %302 = arith.subf %301, %295 : vector<2x32xf32>
    %303 = arith.mulf %302, %300 : vector<2x32xf32>
    %304 = arith.mulf %295, %271 : vector<2x32xf32>
    %305 = arith.addf %303, %304 : vector<2x32xf32>
    %c0_99 = arith.constant 0 : index
    %c7 = arith.constant 7 : index
    %c0_100 = arith.constant 0 : index
    %306 = vector.load %arg7[%c0_99, %c7, %c0_100] : memref<2x8x32xf32, #tpu.memory_space<vmem>>, vector<2x1x32xf32>
    %307 = vector.shape_cast %306 : vector<2x1x32xf32> to vector<2x32xf32>
    %308 = vector.shape_cast %305 : vector<2x32xf32> to vector<2x1x32xf32>
    tpu.vector_store %arg7[%c0_99, %c7, %c0_100], %308 {strides = array<i32>} : memref<2x8x32xf32, #tpu.memory_space<vmem>>, vector<2x1x32xf32>,
    %c0_101 = arith.constant 0 : index
    %c0_102 = arith.constant 0 : index
    %309 = vector.load %arg9[%c0_101, %c0_102] : memref<2x32xf32, #tpu.memory_space<vmem>>, vector<2x32xf32>
    tpu.vector_store %arg9[%c0_101, %c0_102], %305 {strides = array<i32>} : memref<2x32xf32, #tpu.memory_space<vmem>>, vector<2x32xf32>,
    %c1_i32 = arith.constant 1 : i32
    %310 = arith.cmpi eq, %arg1, %c1_i32 : i32
    %311 = arith.extui %310 : i1 to i32
    %c0_i32_103 = arith.constant 0 : i32
    %312 = arith.cmpi ne, %311, %c0_i32_103 : i32
    scf.if %312 {
      %c0_104 = arith.constant 0 : index
      %c0_105 = arith.constant 0 : index
      %c0_106 = arith.constant 0 : index
      %313 = vector.load %arg8[%c0_104, %c0_105, %c0_106] : memref<1x2x32xf32, #tpu.memory_space<vmem>>, vector<1x2x32xf32>
      %314 = vector.shape_cast %313 : vector<1x2x32xf32> to vector<2x32xf32>
      %315 = vector.shape_cast %305 : vector<2x32xf32> to vector<1x2x32xf32>
      tpu.vector_store %arg8[%c0_104, %c0_105, %c0_106], %315 {strides = array<i32>} : memref<1x2x32xf32, #tpu.memory_space<vmem>>, vector<1x2x32xf32>,
    } else {
    }
    return
  }
  func.func @transform_0(%arg0: i32, %arg1: i32) -> (i32, i32, i32) {
    %c0_i32 = arith.constant 0 : i32
    %c0_i32_0 = arith.constant 0 : i32
    return %arg0, %arg1, %c0_i32 : i32, i32, i32
  }
  func.func @transform_1(%arg0: i32, %arg1: i32) -> (i32, i32, i32) {
    %c0_i32 = arith.constant 0 : i32
    %c0_i32_0 = arith.constant 0 : i32
    %c0_i32_1 = arith.constant 0 : i32
    %c0_i32_2 = arith.constant 0 : i32
    return %c0_i32, %c0_i32_0, %c0_i32_1 : i32, i32, i32
  }
  func.func @transform_2(%arg0: i32, %arg1: i32) -> (i32, i32, i32) {
    %c0_i32 = arith.constant 0 : i32
    %c0_i32_0 = arith.constant 0 : i32
    %c0_i32_1 = arith.constant 0 : i32
    %c0_i32_2 = arith.constant 0 : i32
    return %c0_i32, %c0_i32_0, %c0_i32_1 : i32, i32, i32
  }
  func.func @transform_3(%arg0: i32, %arg1: i32) -> (i32, i32, i32) {
    %c0_i32 = arith.constant 0 : i32
    %c0_i32_0 = arith.constant 0 : i32
    %c0_i32_1 = arith.constant 0 : i32
    %c0_i32_2 = arith.constant 0 : i32
    return %c0_i32, %c0_i32_0, %c0_i32_1 : i32, i32, i32
  }
  func.func @transform_4(%arg0: i32, %arg1: i32) -> (i32, i32) {
    %c0_i32 = arith.constant 0 : i32
    %c0_i32_0 = arith.constant 0 : i32
    %c0_i32_1 = arith.constant 0 : i32
    return %c0_i32, %c0_i32_0 : i32, i32
  }
  func.func @transform_5(%arg0: i32, %arg1: i32) -> (i32, i32, i32) {
    %c0_i32 = arith.constant 0 : i32
    %c0_i32_0 = arith.constant 0 : i32
    return %arg0, %arg1, %c0_i32 : i32, i32, i32
  }
  func.func @transform_6(%arg0: i32, %arg1: i32) -> (i32, i32, i32) {
    %c0_i32 = arith.constant 0 : i32
    %c0_i32_0 = arith.constant 0 : i32
    %c0_i32_1 = arith.constant 0 : i32
    return %arg0, %c0_i32, %c0_i32_0 : i32, i32, i32
  }
}

</mosaic_0001>

<bundles_post_ra>
// kernel: tpu_custom_call.1
= control target key start
LH: loop header
LB: loop body
LE: loop exit
PB: predicated region body
PF: predicated region fallthrough
CT: control target
= control target key end

     0   :  { %s3656_s0 = inlined_call_operand.hbm [shape: f32[4,16,32], index: 0, kind: input, shape index: {}]   ;;  %s3657_s1 = inlined_call_operand.hbm [shape: f32[3,32,32], index: 1, kind: input, shape index: {}]   ;;  %s3658_s2 = inlined_call_operand.hbm [shape: f32[3,32,32], index: 2, kind: input, shape index: {}]   ;;  %s3659_s3 = inlined_call_operand.hbm [shape: f32[3,1,32], index: 3, kind: input, shape index: {}]   ;;  %s3660_s4 = inlined_call_operand.vmem [shape: f32[1,32], index: 4, kind: input, shape index: {}]   ;;  %s3661_s5 = inlined_call_operand.hbm [shape: f32[4,16,32], index: 5, kind: output, shape index: {0}]   ;;  %s3662_s6 = inlined_call_operand.hbm [shape: f32[2,2,32], index: 6, kind: output, shape index: {1}]  }
   0x1   :  { %3682 = sst [smem:[#allocation28_spill]] %s3656_s0 }
   0x2   :  { %3683 = sst [smem:[#allocation29_spill]] %s3657_s1 }
   0x3   :  { %3684 = sst [smem:[#allocation30_spill]] %s3658_s2 }
   0x4   :  { %3685 = sst [smem:[#allocation31_spill]] %s3659_s3 }
   0x5   :  { %3686 = sst [smem:[#allocation32_spill]] %s3660_s4 }
   0x6   :  { %3687 = sst [smem:[#allocation33_spill]] %s3661_s5 }
   0x7   :  { %3688 = sst [smem:[#allocation34_spill]] %s3662_s6 }
   0x8   :  { %12 = vsyncpa [#allocation4], 0 }
   0x9   :  { %14 = vsyncpa [#allocation4 + $0x1], 0 }
   0xa   :  { %15 = vsyncpa [#allocation7], 0 }
   0xb   :  { %16 = vsyncpa [#allocation10], 0 }
   0xc   :  { %17 = vsyncpa [#allocation5], 0 }
   0xd   :  { %19 = vsyncpa [#allocation5 + $0x1], 0 }
   0xe   :  { %20 = vsyncpa [#allocation13], 0 }
   0xf   :  { %22 = vsyncpa [#allocation13 + $0x1], 0  ;;  %s2882_s21 = smov 0   ;;  %s2884_s22 = smov 0  }
  0x10   :  { %s2886_s23 = smov 0   ;;  %s2888_s24 = smov 0  }
  0x11   :  { %s2890_s25 = smov 0   ;;  %s2892_s26 = smov 0  }
  0x12   :  { %s2894_s27 = smov 0   ;;  %s2896_s28 = smov 0  }
  0x13   :  { %s2898_s29 = smov 0   ;;  %s2900_s30 = smov 0  }
  0x14   :  { %s2902_s7 = smov 0  }
  0x15 LB: > { %3689 = sst [smem:[#allocation19_spill]] %s2793_s21  ;;  %s2135_s8 = sadd.s32 4294967295, %s2833_s7   ;;  %s2833_s7 = sphi %s2902_s7, %s28_s7   ;;  %s2829_s30 = sphi %s2900_s30, %s3743_s30   ;;  %s2825_s29 = sphi %s2898_s29, %s3742_s29   ;;  %s2821_s28 = sphi %s2896_s28, %s3741_s28   ;;  %s2817_s27 = sphi %s2894_s27, %s3740_s27   ;;  %s2813_s26 = sphi %s2892_s26, %s3739_s26   ;;  %s2809_s25 = sphi %s2890_s25, %s3738_s25   ;;  %s2805_s24 = sphi %s2888_s24, %s3737_s24   ;;  %s2801_s23 = sphi %s2886_s23, %s3736_s23   ;;  %s2797_s22 = sphi %s2884_s22, %s3735_s22   ;;  %s2793_s21 = sphi %s2882_s21, %s3734_s21  }
  0x16   : > { %3690 = sst [smem:[#allocation20_spill]] %s2805_s24  ;;  %s2136_s9 = sadd.s32 4294967294, %s2833_s7  }
  0x17   : > { %3691 = sst [smem:[#allocation21_spill]] %s2821_s28  ;;  %p62_p0 = scmp.ne.s32.totalorder %s2809_s25, %s2805_s24 }
  0x18   : > { %p2941_p1 = scmp.eq.s32.totalorder %s2135_s8, 0  ;;  %p2945_p2 = scmp.eq.s32.totalorder %s2135_s8, 3 }
  0x19   : > { %p178_p3 = scmp.eq.s32.totalorder %s2136_s9, 3  ;;  %p197_p5 = scmp.ne.s32.totalorder %s2801_s23, %s2797_s22 }
  0x1a   : > { %p2951_p4 = por %p2941_p1, %p62_p0  ;;  %p203_p7 = scmp.ne.s32.totalorder %s2797_s22, %s2793_s21 }
  0x1b   : > { %p2957_p6 = por %p178_p3, %p62_p0  ;;  %p2965_p8 = por %p197_p5, %p2945_p2 }
  0x1c   : > { %p2137_p9 = scmp.ge.s32.totalorder %s2833_s7, 1  ;;  %p2970_p10 = por %p203_p7, %p178_p3 }
  0x1d   : > { %s3695_s13 = scalar_select %p2957_p6, 1, 0 }
  0x1e   : > { %s3697_s14 = scalar_select %p2965_p8, 1, 0 }
  0x1f   : > { %3696 = sst [smem:[#allocation22_spill]] %s3695_s13  ;;  %p211_p11 = scmp.lt.s32.totalorder %s2833_s7, 5 }
  0x20   : > { %3698 = sst [smem:[#allocation23_spill]] %s3697_s14  ;;  %s2835_s20 = smov [#allocation6]  }
  0x21   : > { %s3699_s15 = scalar_select %p2970_p10, 1, 0 }
  0x22   : > { %s3701_s1 = sld [smem:[#allocation29_spill]]  ;;  %p2978_p12 = pnand %p2137_p9, %p211_p11 }
  0x23   : > { %3700 = sst [smem:[#allocation24_spill]] %s3699_s15  ;;  %s224_s8 = sshll.u32 %s2835_s20, 4  ;;  %s225_s8 = int_to_ptr.vmem [resolvable:$true] %s224_s8 }
  0x24   : > { %p2245_p13 = pneg %p2978_p12  ;;  %s3704_s2 = sld [smem:[#allocation30_spill]] }
  0x25   : > { %s3667_s17 = smov 128   ;;  %s2838_s20 = smov [#allocation8]  }
  0x26   : > { %p2986_p0 = pnand %p2245_p13, %p2941_p1  ;;  %s238_s13 = sshll.u32 %s2838_s20, 4  ;;  %s239_s13 = int_to_ptr.vmem [resolvable:$true] %s238_s13 }
  0x27   : > { %s3705_s3 = sld [smem:[#allocation31_spill]]  ;;  %s2840_s20 = smov 16  }
  0x28   : > { %s222_s18 = sshll.u32 %s3701_s1, 4  ;;  %s3668_s1 = smov 8   ;;  %s223_s18 = int_to_ptr.hbm [resolvable:$true] %s222_s18 }
  0x29   : > { %2248 = dma.hbm_to_vmem [thread:$0]  (!%p2986_p0), %s223_s18, 1536, %s225_s8, [#allocation7], %s3667_s17, %s3667_s17, %s3668_s1  }
  0x2a   : > { %s236_s16 = sshll.u32 %s3704_s2, 4  ;;  %s2839_s18 = smov [#allocation9]   ;;  %s237_s16 = int_to_ptr.hbm [resolvable:$true] %s236_s16 }
  0x2b   : > { %2251 = dma.hbm_to_vmem [thread:$0]  (!%p2986_p0), %s237_s16, 1536, %s239_s13, [#allocation7], %s3667_s17, %s3667_s17, %s3668_s1  }
  0x2c   : > { %s252_s8 = sshll.u32 %s2839_s18, 4  ;;  %s2841_s24 = smov 1   ;;  %s253_s8 = int_to_ptr.vmem [resolvable:$true] %s252_s8 }
  0x2d   : > { %s250_s2 = sshll.u32 %s3705_s3, 4  ;;  %s37_s21 = sadd.s32 1, %s2825_s29  ;;  %s251_s2 = int_to_ptr.hbm [resolvable:$true] %s250_s2 }
  0x2e   : > { %2254 = dma.hbm_to_vmem [thread:$0]  (!%p2986_p0), %s251_s2, 48, %s253_s8, [#allocation10], %s2840_s20, %s2840_s20, %s2841_s24  }
  0x2f   : > { %p38_p3 = scmp.ge.s32.totalorder %s37_s21, 2  ;;  %s40_s15 = sadd.s32 1, %s2829_s30 }
  0x30   : > { %s49_s3 = sadd.s32 1, %s2813_s26  ;;  %p56_p5 = scmp.ne.s32.totalorder %s2813_s26, %s2809_s25 }
  0x31   : > { %s3745_s21 = smov (%p38_p3, %s37_s21), 0  ;;  %s3747_s15 = smov (!%p38_p3, %s40_s15), %s2829_s30 }
  0x32   : > { %3706 = sst [smem:[#allocation25_spill]] %s3745_s21  ;;  %s45_s13 = ssub.s32 %s2825_s29, %s3745_s21 }
  0x33   : > { %p57_p7 = scmp.eq.s32.totalorder %s2833_s7, 0  ;;  %p42_p9 = scmp.ge.s32.totalorder %s3747_s15, 2 }
  0x34   : > { %p3021_p11 = por %p2945_p2, %p56_p5  ;;  %s187_s9 = sadd.s32 1, %s2801_s23 }
  0x35   : > { %p3025_p13 = por %p57_p7, %p56_p5  ;;  %s3749_s15 = smov (%p42_p9, %s3747_s15), 0 }
  0x36   : > { %s3707_s2 = scalar_select %p3021_p11, 1, 0 }
  0x37   : > { %3710 = sst [smem:[#allocation27_spill]] %s3749_s15  ;;  %p2269_p0 = scmp.lt.s32.totalorder %s2833_s7, 4 }
  0x38   : > { %3708 = sst [smem:[#allocation26_spill]] %s3707_s2  ;;  %s269_s16 = sand.u32 1, %s2813_s26  }
  0x39   : > { %s44_s18 = ssub.s32 %s2829_s30, %s3749_s15  ;;  %s2142_s11 = sshll.u32 %s269_s16, 4 }
  0x3a   : > { %s46_s8 = sor.u32 %s45_s13, %s44_s18  ;;  %p185_p3 = scmp.eq.s32.totalorder %s44_s18, 0 }
  0x3b   : > { %p47_p10 = scmp.eq.s32.totalorder %s46_s8, 0  ;;  %s2225_s1 = sshll.u32 %s2829_s30, 2 }
  0x3c   : > { %s3037_s20 = scalar_select %p185_p3, %s2801_s23, %s187_s9  }
  0x3d   : > { %s3040_s17 = scalar_select %p47_p10, %s2813_s26, %s49_s3  }
  0x3e   : > { %s278_s21 = sadd.s32 %s2825_s29, %s2225_s1  ;;  %s273_s6 = scalar_lea.vmem [#allocation3], %s2142_s11 }
  0x3f   : > { %s283_s14 = sshll.u32 %s273_s6, 4  ;;  %s2145_s5 = sshll.u32 %s278_s21, 3  ;;  %s284_s14 = int_to_ptr.vmem [resolvable:$true] %s283_s14 }
  0x40   : > { %s3711_s0 = sld [smem:[#allocation28_spill]]  ;;  %p2256_p2 = pnand %p2269_p0, %p3025_p13 }
  0x41   : > { %s270_s18 = scalar_lea.sflag [#allocation4], %s269_s16  ;;  %s2842_s9 = smov 256  }
  0x42   : > { %s3712_s8 = smov 8   ;;  %s3713_s3 = smov 128  }
  0x43   : > { %s3056_s1 = sand.u32 (!%p2978_p12), 1, %s2809_s25  }
  0x44   : > { %295 = sbr.rel (%p2978_p12) target bundleno = 1583 (0x62f), region = 40  ;;  %s298_s6 = scalar_lea.sflag (!%p2978_p12), [#allocation4], %s3056_s1 }
  0x46   : > { %s280_s4 = scalar_lea.hbm %s3711_s0, %s2145_s5  ;;  %s2147_s5 = sshll.u32 (!%p2978_p12), %s3056_s1, 4 }
  0x47   : > { %s281_s13 = sshll.u32 %s280_s4, 4  ;;  %s3060_s28 = scalar_lea.vmem (!%p2978_p12), [#allocation3], %s2147_s5  ;;  %s282_s13 = int_to_ptr.hbm [resolvable:$true] %s281_s13 }
  0x48   : > { %2258 = dma.hbm_to_vmem [thread:$0]  (!%p2256_p2), %s282_s13, 256, %s284_s14, %s270_s18, %s2842_s9, %s3713_s3, %s3712_s8  }
  0x49   : > { %2772 = dma.done.wait (%p2951_p4), %s298_s6, 256  }
  0x4a   : > { %2774 = vsyncadd (%p2951_p4), %s298_s6, 4294967040 }
  0x4b   : > { %2776 = dma.done.wait (%p2941_p1), [#allocation7], 3072  }
  0x4c   : > { %2778 = vsyncadd (%p2941_p1), [#allocation7], 4294964224 }
  0x4d   : > { %2780 = dma.done.wait (%p2941_p1), [#allocation10], 48  }
  0x4e   : > { %2782 = vsyncadd (%p2941_p1), [#allocation10], 4294967248  ;;  %s3678_s4 = sand.u32 1, %s2797_s22   ;;  %s3077_s19 = scalar_lea.vmem [#allocation11], %s2147_s5 }
  0x4f   : > { %s2152_s14 = sshll.u32 %s3678_s4, 1  ;;  %p2153_p4 = scmp.ne.s32.totalorder %s2817_s27, 0 }
  0x50   : > { %s3079_s12 = scalar_lea.vmem [#allocation12], %s2152_s14 }
  0x51   : > { %356 = sbr.rel (%p2153_p4) target bundleno = 88 (0x58), region = 60 }
  0x56   : > { %vm357_vm0 = vcmask 254976   ;;  %v2843_v0 = vmov 0.0  }
  0x57   : > { %358 = vst.msk [vmem:[#allocation2] sm:$0x3] %vm357_vm0, %v2843_v0 }
  0x58 PF: > { %v364_v1 = vld [vmem:[#allocation6 + $0x18] sm:$0xff]  ;;  %v363_v3 = vld [vmem:[#allocation6 + $0x10] sm:$0xff]  ;;  %v362_v5 = vld [vmem:[#allocation6 + $0x8] sm:$0xff]  ;;  %vm369_vm1 = vcmask 261120   ;;  %s3714_s2 = sld [smem:[#allocation32_spill]]  ;;  %p2216_p1 = scmp.ne.s32.totalorder %s2817_s27, 1 }
  0x59   : > { %v3082_v2 = vld [vmem:[#allocation8 + $0x18] sm:$0xff]  ;;  %388 = vmatpush.msra.mxu0 %v364_v1  ;;  %v3085_v4 = vld [vmem:[#allocation8 + $0x10] sm:$0xff]  ;;  %v3087_v6 = vld [vmem:[#allocation8 + $0x8] sm:$0xff] }
  0x5a   : > { %496 = vmatpush.msra.mxu3 %v3082_v2  ;;  %v403_v7 = vld [vmem:[#allocation6 + $0x38] sm:$0xff]  ;;  %v402_v8 = vld [vmem:[#allocation6 + $0x30] sm:$0xff]  ;;  %v361_v9 = vld [vmem:[#allocation6] sm:$0xff] }
  0x5b   : > { %389 = vmatpush.msra.mxu0 %v363_v3  ;;  %421 = vmatpush.msra.mxu1 %v403_v7  ;;  %v3090_v10 = vld [vmem:[#allocation8] sm:$0xff]  ;;  %v3096_v13 = vld [vmem:[#allocation8 + $0x38] sm:$0xff]  ;;  %v401_v14 = vld [vmem:[#allocation6 + $0x28] sm:$0xff] }
  0x5c   : > { %497 = vmatpush.msra.mxu3 %v3085_v4  ;;  %v359_v11 = vld [vmem:[%s3060_s28] sm:$0xff]  ;;  %v436_v15 = vld [vmem:[#allocation6 + $0x58] sm:$0xff]  ;;  %v3106_v19 = vld [vmem:[#allocation8 + $0x28] sm:$0xff] }
  0x5d   : > { %390 = vmatpush.msra.mxu0 %v362_v5  ;;  %422 = vmatpush.msra.mxu1 %v402_v8  ;;  %v3099_v16 = vld [vmem:[#allocation8 + $0x58] sm:$0xff]  ;;  %v3104_v17 = vld [vmem:[#allocation8 + $0x30] sm:$0xff]  ;;  %v400_v18 = vld [vmem:[#allocation6 + $0x20] sm:$0xff] }
  0x5e   : > { %498 = vmatpush.msra.mxu3 %v3087_v6  ;;  %v3094_v12 = vld [vmem:[#allocation2] sm:$0x3]  ;;  %v435_v20 = vld [vmem:[#allocation6 + $0x50] sm:$0xff]  ;;  %454 = vmatpush.msra.mxu2 %v436_v15  ;;  %v434_v22 = vld [vmem:[#allocation6 + $0x48] sm:$0xff] }
  0x5f   : > { %391 = vmatpush.msra.mxu0 %v361_v9  ;;  %423 = vmatpush.msra.mxu1 %v401_v14  ;;  %v3110_v21 = vld [vmem:[#allocation8 + $0x50] sm:$0xff]  ;;  %v3114_v23 = vld [vmem:[#allocation8 + $0x20] sm:$0xff]  ;;  %v3116_v24 = vld [vmem:[#allocation8 + $0x48] sm:$0xff] }
  0x60   : > { %499 = vmatpush.msra.mxu3 %v3090_v10  ;;  %2154 = vmatmul.msk.f32.vlgmr.msra.gmra.mxu0 %vm369_vm1, %v359_v11  ;;  %v360_v25 = vld [vmem:[%s3060_s28 + $0x8] sm:$0xff]  ;;  %v433_v26 = vld [vmem:[#allocation6 + $0x40] sm:$0xff] }
  0x61   : > { %2160 = vmatmul.msk.f32.vlgmr.msra.gmra.mxu3 %vm369_vm1, %v3094_v12  ;;  %539 = vmatpush.msrb.mxu0 %v3099_v16  ;;  %v3121_v27 = vld [vmem:[#allocation8 + $0x40] sm:$0xff]  ;;  %v3183_v61 = vld [vmem:[%s3714_s2] ss:$0 sm:$0xff] }
  0x62   : > { %516 = vmatpush.msrb.mxu3 %v3096_v13  ;;  %424 = vmatpush.msra.mxu1 %v400_v18  ;;  %v2374_v29 = vld [vmem:[#allocation9] ss:$0 sm:$0xff]  ;;  %v2375_v36 = vld [vmem:[#allocation9 + $0x1] ss:$0 sm:$0xff]  ;;  %v2376_v62 = vld [vmem:[#allocation9 + $0x2] ss:$0 sm:$0xff] }
  0x63   : > { %2156 = vmatmul.msk.f32.vlgmr.msra.gmra.mxu1 %vm369_vm1, %v359_v11  ;;  %455 = vmatpush.msra.mxu2 %v435_v20 }
  0x64   : > { %517 = vmatpush.msrb.mxu3 %v3104_v17  ;;  %540 = vmatpush.msrb.mxu0 %v3110_v21 }
  0x65   : > { %456 = vmatpush.msra.mxu2 %v434_v22  ;;  %678 = vmatpush.msrb.mxu1 %v3082_v2 }
  0x66   : > { %518 = vmatpush.msrb.mxu3 %v3106_v19  ;;  %541 = vmatpush.msrb.mxu0 %v3116_v24 }
  0x67   : > { %457 = vmatpush.msra.mxu2 %v433_v26  ;;  %679 = vmatpush.msrb.mxu1 %v3085_v4 }
  0x68   : > { %519 = vmatpush.msrb.mxu3 %v3114_v23  ;;  %2155 = vmatmul.msk.f32.gmra.mxu0 %vm369_vm1, %v360_v25 }
  0x69   : > { %2161 = vmatmul.msk.f32.vlgmr.msrb.gmra.mxu3 %vm369_vm1, %v3094_v12  ;;  %542 = vmatpush.msrb.mxu0 %v3121_v27 }
  0x6a   : > { %2158 = vmatmul.msk.f32.vlgmr.msra.gmra.mxu2 %vm369_vm1, %v359_v11  ;;  %718 = vmatpush.msra.mxu3 %v3099_v16 }
  0x6b   : > { %698 = vmatpush.msrb.mxu2 %v3096_v13  ;;  %2157 = vmatmul.msk.f32.gmra.mxu1 %vm369_vm1, %v360_v25 }
  0x6c   : > { %856 = vmatpush.msra.mxu0 %v3082_v2  ;;  %680 = vmatpush.msrb.mxu1 %v3087_v6 }
  0x6d   : > { %699 = vmatpush.msrb.mxu2 %v3104_v17  ;;  %719 = vmatpush.msra.mxu3 %v3110_v21 }
  0x6e   : > { %857 = vmatpush.msra.mxu0 %v3085_v4  ;;  %681 = vmatpush.msrb.mxu1 %v3090_v10 }
  0x6f   : > { %700 = vmatpush.msrb.mxu2 %v3106_v19  ;;  %720 = vmatpush.msra.mxu3 %v3116_v24 }
  0x70   : > { %2162 = vmatmul.msk.f32.vlgmr.msrb.gmra.mxu0 %vm369_vm1, %v3094_v12  ;;  %876 = vmatpush.msra.mxu1 %v3096_v13 }
  0x71   : > { %701 = vmatpush.msrb.mxu2 %v3114_v23  ;;  %721 = vmatpush.msra.mxu3 %v3121_v27 }
  0x72   : > { %2159 = vmatmul.msk.f32.gmra.mxu2 %vm369_vm1, %v360_v25  ;;  %877 = vmatpush.msra.mxu1 %v3104_v17 }
  0x73   : > { %896 = vmatpush.msra.mxu2 %v3099_v16  ;;  %858 = vmatpush.msra.mxu0 %v3087_v6 }
  0x74   : > { %1039 = vmatpush.msrb.mxu3 %v3082_v2  ;;  %878 = vmatpush.msra.mxu1 %v3106_v19 }
  0x75   : > { %897 = vmatpush.msra.mxu2 %v3110_v21  ;;  %859 = vmatpush.msra.mxu0 %v3090_v10 }
  0x76   : > { %1040 = vmatpush.msrb.mxu3 %v3085_v4  ;;  %879 = vmatpush.msra.mxu1 %v3114_v23 }
  0x77   : > { %898 = vmatpush.msra.mxu2 %v3116_v24  ;;  %1059 = vmatpush.msrb.mxu0 %v3096_v13 }
  0x78   : > { %1041 = vmatpush.msrb.mxu3 %v3087_v6 }
  0x79   : > { %899 = vmatpush.msra.mxu2 %v3121_v27  ;;  %1060 = vmatpush.msrb.mxu0 %v3104_v17 }
  0x7a   : > { %1042 = vmatpush.msrb.mxu3 %v3090_v10 }
  0x7b   : > { %1061 = vmatpush.msrb.mxu0 %v3106_v19 }
  0x7d   : > { %1062 = vmatpush.msrb.mxu0 %v3114_v23 }
  0xdd   : > { %v393_v28 = vpop.f32.mrf.mxu0 }
  0xde   : > { %v3166_v31 = vadd.f32 %v2374_v29, %v393_v28 }
  0xe0   : > { %v426_v30 = vpop.f32.mrf.mxu1 }
  0xe1   : > { %v3172_v41 = vadd.f32 %v2375_v36, %v426_v30 }
  0xe4   : > { %v501_v32 = vpop.f32.mrf.mxu3 }
  0xe5   : > { %v548_v33 = vrot.slane %v501_v32, 1  ;;  %v551_v34 = vadd.f32 %v501_v32, %v3166_v31  ;;  %v396_v35 = vpop.f32.mrf.mxu0 }
  0xe6   : > { %v3169_v38 = vadd.f32 %v2374_v29, %v396_v35 }
  0xe7   : > { %v2163_v37 = vmul.f32 -1.442695, %v551_v34 }
  0xe8   : > { %v552_v39 = vadd.f32 %v548_v33, %v3169_v38  ;;  %v429_v40 = vpop.f32.mrf.mxu1 }
  0xe9   : > { %2378 = vpow2.f32 %v2163_v37  ;;  %v3174_v42 = vadd.f32 %v2375_v36, %v429_v40 }
  0xea   : > { %v2164_v43 = vmul.f32 -1.442695, %v552_v39 }
  0xec   : > { %v521_v44 = vpop.f32.mrf.mxu3  ;;  %2380 = vpow2.f32 %v2164_v43 }
  0xed   : > { %v592_v45 = vrot.slane %v521_v44, 1  ;;  %v595_v46 = vadd.f32 %v521_v44, %v3172_v41  ;;  %v459_v54 = vpop.f32.mrf.mxu2  ;;  %v544_v63 = vpop.f32.mrf.mxu0 }
  0xee   : > { %v545_v9 = vadd.f32 %v3183_v61, %v544_v63  ;;  %v3187_v14 = vadd.f32 %v2376_v62, %v459_v54 }
  0xef   : > { %v2379_v47 = vpop.eup %2378  ;;  %v596_v48 = vadd.f32 %v592_v45, %v3174_v42  ;;  %v2165_v49 = vmul.f32 -1.442695, %v595_v46 }
  0xf0   : > { %v559_v50 = vadd.f32 1.0, %v2379_v47  ;;  %v636_v28 = vrot.slane %v545_v9, 1 }
  0xf1   : > { %2382 = vpow2.f32 %v2165_v49  ;;  %v2166_v51 = vmul.f32 -1.442695, %v596_v48 }
  0xf2   : > { %2384 = vrcp.f32 %v559_v50  ;;  %v2381_v52 = vpop.eup %2380  ;;  %v570_v3 = vand.u32 2147483647, %v559_v50  ;;  %v572_v5 = vand.u32 2147483648, %v559_v50  ;;  %vm566_vm3 = vweird.f32 %v559_v50 }
  0xf3   : > { %2386 = vpow2.f32 %v2166_v51  ;;  %v560_v53 = vadd.f32 1.0, %v2381_v52 }
  0xf4   : > { %vm571_vm5 = vcmp.eq.f32.partialorder %v570_v3, 8.507059e+37  ;;  %v573_v25 = vor.u32 1.1754944e-38, %v572_v5 }
  0xf5   : > { %2388 = vrcp.f32 %v560_v53  ;;  %v585_v11 = vand.u32 2147483647, %v560_v53  ;;  %v462_v20 = vpop.f32.mrf.mxu2  ;;  %v587_v26 = vand.u32 2147483648, %v560_v53  ;;  %vm581_vm7 = vweird.f32 %v560_v53 }
  0xf6   : > { %v3189_v35 = vadd.f32 %v2376_v62, %v462_v20 }
  0xf7   : > { %v2383_v55 = vpop.eup %2382  ;;  %vm586_vm8 = vcmp.eq.f32.partialorder %v585_v11, 8.507059e+37  ;;  %v588_v43 = vor.u32 1.1754944e-38, %v587_v26 }
  0xf8   : > { %v2385_v56 = vpop.eup %2384  ;;  %v603_v57 = vadd.f32 1.0, %v2383_v55 }
  0xf9   : > { %v2387_v58 = vpop.eup %2386  ;;  %v562_v59 = vmul.f32 %v2385_v56, %v559_v50  ;;  %vm567_vm2 = vweird.f32 %v2385_v56 }
  0xfa   : > { %v3178_v60 = vadd.f32 1.0, %v2387_v58  ;;  %2390 = vrcp.f32 %v603_v57  ;;  %vm568_vm4 = vmor %vm566_vm3, %vm567_vm2  ;;  %v614_v44 = vand.u32 2147483647, %v603_v57  ;;  %v616_v45 = vand.u32 2147483648, %v603_v57 }
  0xfb   : > { %v563_v0 = vsub.f32 1.0, %v562_v59  ;;  %v2389_v1 = vpop.eup %2388  ;;  %vm610_vm11 = vweird.f32 %v603_v57  ;;  %vm656_vm3 = vcmask 253952  }
  0xfc   : > { %2392 = vrcp.f32 %v3178_v60  ;;  %v577_v8 = vmul.f32 %v2389_v1, %v560_v53  ;;  %vm582_vm6 = vweird.f32 %v2389_v1  ;;  %v631_v51 = vand.u32 2147483648, %v3178_v60 }
  0xfd   : > { %v564_v7 = vmul.f32 %v2385_v56, %v563_v0  ;;  %vm583_vm9 = vmor %vm581_vm7, %vm582_vm6  ;;  %vm615_vm14 = vcmp.eq.f32.partialorder %v614_v44, 8.507059e+37  ;;  %v617_v55 = vor.u32 1.1754944e-38, %v616_v45  ;;  %vm625_vm15 = vweird.f32 %v3178_v60 }
  0xfe   : > { %v578_v18 = vsub.f32 1.0, %v577_v8  ;;  %v632_v0 = vor.u32 1.1754944e-38, %v631_v51  ;;  %v649_v8 = vrot.slane %v3094_v12, 1 }
  0xff   : > { %v565_v15 = vadd.f32 %v2385_v56, %v564_v7 }
 0x100   : > { %v2391_v22 = vpop.eup %2390  ;;  %v579_v32 = vmul.f32 %v2389_v1, %v578_v18 }
 0x101   : > { %v606_v29 = vmul.f32 %v2391_v22, %v603_v57  ;;  %v569_v30 = vsel %vm568_vm4, %v2385_v56, %v565_v15  ;;  %vm611_vm10 = vweird.f32 %v2391_v22  ;;  %v629_v56 = vand.u32 2147483647, %v3178_v60 }
 0x102   : > { %v2393_v33 = vpop.eup %2392  ;;  %v574_v34 = vsel %vm571_vm5, %v573_v25, %v569_v30  ;;  %v580_v39 = vadd.f32 %v2389_v1, %v579_v32  ;;  %vm612_vm13 = vmor %vm610_vm11, %vm611_vm10  ;;  %vm662_vm4 = vcmask 1041409  }
 0x103   : > { %v607_v36 = vsub.f32 1.0, %v606_v29  ;;  %v621_v37 = vmul.f32 %v2393_v33, %v3178_v60  ;;  %v639_v40 = vmul.f32 %v574_v34, %v545_v9  ;;  %vm626_vm12 = vweird.f32 %v2393_v33 }
 0x104   : > { %v584_v48 = vsel %vm583_vm9, %v2389_v1, %v580_v39  ;;  %vm627_vm0 = vmor %vm625_vm15, %vm626_vm12  ;;  %vm630_vm2 = vcmp.eq.f32.partialorder %v629_v56, 8.507059e+37 }
 0x105   : > { %v608_v46 = vmul.f32 %v2391_v22, %v607_v36  ;;  %v622_v47 = vsub.f32 1.0, %v621_v37  ;;  %v641_v49 = vadd.f32 %v639_v40, %v3187_v14  ;;  %v589_v50 = vsel %vm586_vm8, %v588_v43, %v584_v48 }
 0x106   : > { %v640_v53 = vmul.f32 %v636_v28, %v589_v50 }
 0x107   : > { %v623_v52 = vmul.f32 %v2393_v33, %v622_v47  ;;  %2394 = vtanh.f32 %v641_v49  ;;  %v609_v54 = vadd.f32 %v2391_v22, %v608_v46 }
 0x108   : > { %v642_v62 = vadd.f32 %v640_v53, %v3189_v35 }
 0x109   : > { %v613_v58 = vsel %vm612_vm13, %v2391_v22, %v609_v54  ;;  %v624_v59 = vadd.f32 %v2393_v33, %v623_v52 }
 0x10a   : > { %v618_v57 = vsel %vm615_vm14, %v617_v55, %v613_v58  ;;  %2396 = vtanh.f32 %v642_v62 }
 0x10b   : > { %v628_v63 = vsel %vm627_vm0, %v2393_v33, %v624_v59  ;;  %v645_v1 = vsub.f32 1.0, %v618_v57  ;;  %v652_v9 = vmul.f32 %v618_v57, %v3094_v12 }
 0x10c   : > { %v633_v5 = vsel %vm630_vm2, %v632_v0, %v628_v63 }
 0x10d   : > { %v2395_v3 = vpop.eup %2394  ;;  %v646_v60 = vsub.f32 1.0, %v633_v5  ;;  %v653_v20 = vmul.f32 %v649_v8, %v633_v5 }
 0x10e   : > { %v647_v7 = vmul.f32 %v2395_v3, %v645_v1 }
 0x110   : > { %v3201_v11 = vadd.f32 %v652_v9, %v647_v7  ;;  %v2397_v15 = vpop.eup %2396 }
 0x111   : > { %v648_v18 = vmul.f32 %v2397_v15, %v646_v60 }
 0x112   : > { %657 = vst.msk [vmem:[%s3077_s19] sm:$0x1] %vm656_vm3, %v3201_v11 }
 0x113   : > { %v3206_v22 = vadd.f32 %v653_v20, %v648_v18 }
 0x115   : > { %658 = vst.msk [vmem:[%s3077_s19 + $0x8] sm:$0x1] %vm656_vm3, %v3206_v22  ;;  %v661_v25 = vrot.slane %v3206_v22, 7 }
 0x117   : > { %v663_v12 = vsel %vm662_vm4, %v661_v25, %v3201_v11 }
 0x118   : > { %2167 = vmatmul.msk.f32.vlgmr.msrb.gmra.mxu1 %vm369_vm1, %v663_v12  ;;  %2168 = vmatmul.msk.f32.vlgmr.msrb.gmra.mxu2 %vm369_vm1, %v663_v12 }
 0x119   : > { %2169 = vmatmul.msk.f32.vlgmr.msra.gmra.mxu3 %vm369_vm1, %v663_v12  ;;  %1079 = vmatpush.msrb.mxu1 %v3099_v16 }
 0x11a   : > { %1222 = vmatpush.msrb.mxu2 %v3082_v2  ;;  %1242 = vmatpush.msra.mxu3 %v3096_v13 }
 0x11b   : > { %1080 = vmatpush.msrb.mxu1 %v3110_v21 }
 0x11c   : > { %1223 = vmatpush.msrb.mxu2 %v3085_v4  ;;  %1243 = vmatpush.msra.mxu3 %v3104_v17 }
 0x11d   : > { %1081 = vmatpush.msrb.mxu1 %v3116_v24 }
 0x11e   : > { %1224 = vmatpush.msrb.mxu2 %v3087_v6  ;;  %1244 = vmatpush.msra.mxu3 %v3106_v19 }
 0x11f   : > { %1082 = vmatpush.msrb.mxu1 %v3121_v27 }
 0x120   : > { %1225 = vmatpush.msrb.mxu2 %v3090_v10  ;;  %1245 = vmatpush.msra.mxu3 %v3114_v23 }
 0x195   : > { %v683_v26 = vpop.f32.mrf.mxu1 }
 0x196   : > { %v727_v28 = vrot.slane %v683_v26, 7  ;;  %v731_v29 = vadd.f32 %v683_v26, %v3169_v38 }
 0x198   : > { %v730_v30 = vadd.f32 %v727_v28, %v3166_v31  ;;  %v2171_v32 = vmul.f32 -1.442695, %v731_v29 }
 0x19a   : > { %v2170_v33 = vmul.f32 -1.442695, %v730_v30  ;;  %2398 = vpow2.f32 %v2171_v32 }
 0x19b   : > { %v703_v34 = vpop.f32.mrf.mxu2 }
 0x19c   : > { %2400 = vpow2.f32 %v2170_v33  ;;  %v771_v36 = vrot.slane %v703_v34, 7  ;;  %v775_v37 = vadd.f32 %v703_v34, %v3174_v42  ;;  %v723_v51 = vpop.f32.mrf.mxu3 }
 0x19d   : > { %v724_v56 = vadd.f32 %v3183_v61, %v723_v51 }
 0x19e   : > { %v774_v39 = vadd.f32 %v771_v36, %v3172_v41  ;;  %v2173_v40 = vmul.f32 -1.442695, %v775_v37 }
 0x19f   : > { %v815_v7 = vrot.slane %v724_v56, 7 }
 0x1a0   : > { %v2399_v43 = vpop.eup %2398  ;;  %v2172_v44 = vmul.f32 -1.442695, %v774_v39  ;;  %2402 = vpow2.f32 %v2173_v40 }
 0x1a1   : > { %v739_v45 = vadd.f32 1.0, %v2399_v43 }
 0x1a2   : > { %v2401_v46 = vpop.eup %2400  ;;  %2404 = vpow2.f32 %v2172_v44 }
 0x1a3   : > { %v738_v47 = vadd.f32 1.0, %v2401_v46  ;;  %2406 = vrcp.f32 %v739_v45  ;;  %v764_v57 = vand.u32 2147483647, %v739_v45  ;;  %v766_v63 = vand.u32 2147483648, %v739_v45 }
 0x1a4   : > { %vm760_vm5 = vweird.f32 %v739_v45 }
 0x1a5   : > { %2408 = vrcp.f32 %v738_v47  ;;  %v749_v62 = vand.u32 2147483647, %v738_v47  ;;  %v751_v1 = vand.u32 2147483648, %v738_v47  ;;  %vm745_vm8 = vweird.f32 %v738_v47 }
 0x1a6   : > { %v2403_v48 = vpop.eup %2402  ;;  %vm765_vm10 = vcmp.eq.f32.partialorder %v764_v57, 8.507059e+37  ;;  %v767_v20 = vor.u32 1.1754944e-38, %v766_v63  ;;  %v828_v63 = vrot.slane %v3201_v11, 7 }
 0x1a7   : > { %v3235_v49 = vadd.f32 1.0, %v2403_v48  ;;  %vm3243_vm9 = vcmp.eq.f32.partialorder %v749_v62, 8.507059e+37  ;;  %v752_v29 = vor.u32 1.1754944e-38, %v751_v1 }
 0x1a8   : > { %v2405_v50 = vpop.eup %2404 }
 0x1a9   : > { %v2407_v52 = vpop.eup %2406  ;;  %v3237_v53 = vadd.f32 1.0, %v2405_v50  ;;  %2410 = vrcp.f32 %v3235_v49  ;;  %vm804_vm12 = vweird.f32 %v3235_v49  ;;  %v808_v30 = vand.u32 2147483647, %v3235_v49 }
 0x1aa   : > { %v756_v54 = vmul.f32 %v2407_v52, %v739_v45  ;;  %vm761_vm6 = vweird.f32 %v2407_v52  ;;  %v810_v40 = vand.u32 2147483648, %v3235_v49 }
 0x1ab   : > { %v2409_v55 = vpop.eup %2408  ;;  %2412 = vrcp.f32 %v3237_v53  ;;  %vm762_vm11 = vmor %vm760_vm5, %vm761_vm6  ;;  %v795_v39 = vand.u32 2147483648, %v3237_v53  ;;  %v793_v48 = vand.u32 2147483647, %v3237_v53  ;;  %vm789_vm2 = vweird.f32 %v3237_v53 }
 0x1ac   : > { %v741_v58 = vmul.f32 %v2409_v55, %v738_v47  ;;  %v757_v59 = vsub.f32 1.0, %v756_v54  ;;  %vm746_vm7 = vweird.f32 %v2409_v55  ;;  %vm809_vm6 = vcmp.eq.f32.partialorder %v808_v30, 8.507059e+37 }
 0x1ad   : > { %vm747_vm14 = vmor %vm745_vm8, %vm746_vm7  ;;  %vm794_vm7 = vcmp.eq.f32.partialorder %v793_v48, 8.507059e+37  ;;  %vm835_vm8 = vcmask 254977  }
 0x1ae   : > { %v742_v0 = vsub.f32 1.0, %v741_v58  ;;  %v758_v3 = vmul.f32 %v2407_v52, %v757_v59 }
 0x1af   : > { %v2411_v5 = vpop.eup %2410 }
 0x1b0   : > { %v800_v8 = vmul.f32 %v2411_v5, %v3235_v49  ;;  %v743_v9 = vmul.f32 %v2409_v55, %v742_v0  ;;  %v759_v60 = vadd.f32 %v2407_v52, %v758_v3  ;;  %vm805_vm13 = vweird.f32 %v2411_v5 }
 0x1b1   : > { %v2413_v15 = vpop.eup %2412  ;;  %vm806_vm0 = vmor %vm804_vm12, %vm805_vm13 }
 0x1b2   : > { %v785_v12 = vmul.f32 %v2413_v15, %v3237_v53  ;;  %v801_v26 = vsub.f32 1.0, %v800_v8  ;;  %v744_v28 = vadd.f32 %v2409_v55, %v743_v9  ;;  %v763_v32 = vsel %vm762_vm11, %v2407_v52, %v759_v60 }
 0x1b3   : > { %v768_v37 = vsel %vm765_vm10, %v767_v20, %v763_v32  ;;  %vm790_vm15 = vweird.f32 %v2413_v15 }
 0x1b4   : > { %v786_v33 = vsub.f32 1.0, %v785_v12  ;;  %v802_v34 = vmul.f32 %v2411_v5, %v801_v26  ;;  %v748_v36 = vsel %vm747_vm14, %v2409_v55, %v744_v28  ;;  %v819_v44 = vmul.f32 %v768_v37, %v724_v56  ;;  %vm791_vm5 = vmor %vm789_vm2, %vm790_vm15 }
 0x1b5   : > { %v753_v43 = vsel %vm3243_vm9, %v752_v29, %v748_v36  ;;  %v811_v55 = vor.u32 1.1754944e-38, %v810_v40  ;;  %v796_v56 = vor.u32 1.1754944e-38, %v795_v39 }
 0x1b6   : > { %v787_v45 = vmul.f32 %v2413_v15, %v786_v33  ;;  %v803_v46 = vadd.f32 %v2411_v5, %v802_v34  ;;  %v818_v47 = vmul.f32 %v815_v7, %v753_v43  ;;  %v821_v50 = vadd.f32 %v819_v44, %v3189_v35 }
 0x1b8   : > { %v788_v51 = vadd.f32 %v2413_v15, %v787_v45  ;;  %v807_v52 = vsel %vm806_vm0, %v2411_v5, %v803_v46  ;;  %v820_v54 = vadd.f32 %v818_v47, %v3187_v14  ;;  %2414 = vtanh.f32 %v821_v50 }
 0x1b9   : > { %v812_v49 = vsel %vm809_vm6, %v811_v55, %v807_v52 }
 0x1ba   : > { %v792_v58 = vsel %vm791_vm5, %v2413_v15, %v788_v51  ;;  %2416 = vtanh.f32 %v820_v54  ;;  %v825_v62 = vsub.f32 1.0, %v812_v49  ;;  %v832_v3 = vmul.f32 %v812_v49, %v661_v25 }
 0x1bb   : > { %v797_v59 = vsel %vm794_vm7, %v796_v56, %v792_v58 }
 0x1bc   : > { %v824_v53 = vsub.f32 1.0, %v797_v59  ;;  %v831_v7 = vmul.f32 %v828_v63, %v797_v59 }
 0x1be   : > { %v2415_v57 = vpop.eup %2414 }
 0x1bf   : > { %v827_v1 = vmul.f32 %v2415_v57, %v825_v62 }
 0x1c0   : > { %v2417_v0 = vpop.eup %2416 }
 0x1c1   : > { %v826_v5 = vmul.f32 %v2417_v0, %v824_v53  ;;  %v3267_v8 = vadd.f32 %v832_v3, %v827_v1 }
 0x1c3   : > { %v3269_v9 = vadd.f32 %v831_v7, %v826_v5  ;;  %837 = vst.msk [vmem:[%s3077_s19 + $0x8] sm:$0x2] %vm835_vm8, %v3267_v8 }
 0x1c5   : > { %836 = vst.msk [vmem:[%s3077_s19] sm:$0x2] %vm835_vm8, %v3269_v9  ;;  %v840_v60 = vrot.slane %v3269_v9, 1 }
 0x1c7   : > { %v841_v11 = vsel %vm662_vm4, %v3267_v8, %v840_v60 }
 0x1c8   : > { %2174 = vmatmul.msk.f32.vlgmr.msra.gmra.mxu0 %vm369_vm1, %v841_v11  ;;  %2175 = vmatmul.msk.f32.vlgmr.msra.gmra.mxu1 %vm369_vm1, %v841_v11 }
 0x1c9   : > { %2176 = vmatmul.msk.f32.vlgmr.msra.gmra.mxu2 %vm369_vm1, %v841_v11  ;;  %1262 = vmatpush.msra.mxu0 %v3099_v16 }
 0x1ca   : > { %1405 = vmatpush.msra.mxu1 %v3082_v2  ;;  %1425 = vmatpush.msra.mxu2 %v3096_v13 }
 0x1cb   : > { %1263 = vmatpush.msra.mxu0 %v3110_v21 }
 0x1cc   : > { %1406 = vmatpush.msra.mxu1 %v3085_v4  ;;  %1426 = vmatpush.msra.mxu2 %v3104_v17 }
 0x1cd   : > { %1264 = vmatpush.msra.mxu0 %v3116_v24 }
 0x1ce   : > { %1407 = vmatpush.msra.mxu1 %v3087_v6  ;;  %1427 = vmatpush.msra.mxu2 %v3106_v19 }
 0x1cf   : > { %1265 = vmatpush.msra.mxu0 %v3121_v27 }
 0x1d0   : > { %1408 = vmatpush.msra.mxu1 %v3090_v10  ;;  %1428 = vmatpush.msra.mxu2 %v3114_v23 }
 0x245   : > { %v861_v22 = vpop.f32.mrf.mxu0  ;;  %v881_v25 = vpop.f32.mrf.mxu1 }
 0x246   : > { %v905_v15 = vrot.slane %v861_v22, 6  ;;  %v906_v18 = vrot.slane %v861_v22, 7  ;;  %v950_v20 = vrot.slane %v881_v25, 6  ;;  %v951_v12 = vrot.slane %v881_v25, 7 }
 0x248   : > { %v909_v26 = vadd.f32 %v905_v15, %v3166_v31  ;;  %v910_v28 = vadd.f32 %v906_v18, %v3169_v38  ;;  %v954_v29 = vadd.f32 %v950_v20, %v3172_v41  ;;  %v955_v30 = vadd.f32 %v951_v12, %v3174_v42 }
 0x24a   : > { %v2177_v32 = vmul.f32 -1.442695, %v909_v26  ;;  %v2178_v33 = vmul.f32 -1.442695, %v910_v28  ;;  %v2179_v34 = vmul.f32 -1.442695, %v954_v29 }
 0x24b   : > { %v2180_v36 = vmul.f32 -1.442695, %v955_v30 }
 0x24c   : > { %2418 = vpow2.f32 %v2177_v32  ;;  %v901_v48 = vpop.f32.mrf.mxu2 }
 0x24d   : > { %2420 = vpow2.f32 %v2178_v33  ;;  %v902_v50 = vadd.f32 %v3183_v61, %v901_v48 }
 0x24e   : > { %2422 = vpow2.f32 %v2179_v34 }
 0x24f   : > { %2424 = vpow2.f32 %v2180_v36  ;;  %v995_v57 = vrot.slane %v902_v50, 6  ;;  %v996_v22 = vrot.slane %v902_v50, 7 }
 0x252   : > { %v2419_v37 = vpop.eup %2418 }
 0x253   : > { %v2421_v39 = vpop.eup %2420  ;;  %v917_v40 = vadd.f32 1.0, %v2419_v37 }
 0x254   : > { %v2423_v43 = vpop.eup %2422  ;;  %v918_v44 = vadd.f32 1.0, %v2421_v39 }
 0x255   : > { %v2425_v45 = vpop.eup %2424  ;;  %2426 = vrcp.f32 %v917_v40  ;;  %v3297_v46 = vadd.f32 1.0, %v2423_v43  ;;  %v928_v62 = vand.u32 2147483647, %v917_v40  ;;  %v930_v53 = vand.u32 2147483648, %v917_v40 }
 0x256   : > { %2428 = vrcp.f32 %v918_v44  ;;  %v3299_v47 = vadd.f32 1.0, %v2425_v45  ;;  %v943_v1 = vand.u32 2147483647, %v918_v44  ;;  %v945_v7 = vand.u32 2147483648, %v918_v44 }
 0x257   : > { %2430 = vrcp.f32 %v3297_v46  ;;  %vm924_vm11 = vweird.f32 %v917_v40  ;;  %vm939_vm12 = vweird.f32 %v918_v44  ;;  %v975_v18 = vand.u32 2147483648, %v3297_v46 }
 0x258   : > { %2432 = vrcp.f32 %v3299_v47  ;;  %v931_v12 = vor.u32 1.1754944e-38, %v930_v53  ;;  %vm929_vm14 = vcmp.eq.f32.partialorder %v928_v62, 8.507059e+37  ;;  %vm944_vm0 = vcmp.eq.f32.partialorder %v943_v1, 8.507059e+37 }
 0x259   : > { %v946_v29 = vor.u32 1.1754944e-38, %v945_v7  ;;  %vm969_vm6 = vweird.f32 %v3297_v46  ;;  %v973_v39 = vand.u32 2147483647, %v3297_v46  ;;  %vm984_vm8 = vweird.f32 %v3299_v47 }
 0x25a   : > { %v1010_v62 = vrot.slane %v3267_v8, 7 }
 0x25b   : > { %v2427_v51 = vpop.eup %2426 }
 0x25c   : > { %v2429_v52 = vpop.eup %2428  ;;  %v920_v54 = vmul.f32 %v2427_v51, %v917_v40  ;;  %vm925_vm9 = vweird.f32 %v2427_v51  ;;  %v990_v40 = vand.u32 2147483648, %v3299_v47 }
 0x25d   : > { %v2431_v55 = vpop.eup %2430  ;;  %v935_v56 = vmul.f32 %v2429_v52, %v918_v44  ;;  %vm940_vm10 = vweird.f32 %v2429_v52  ;;  %vm926_vm13 = vmor %vm924_vm11, %vm925_vm9  ;;  %v988_v44 = vand.u32 2147483647, %v3299_v47 }
 0x25e   : > { %v2433_v58 = vpop.eup %2432  ;;  %v965_v49 = vmul.f32 %v2431_v55, %v3297_v46  ;;  %v921_v59 = vsub.f32 1.0, %v920_v54  ;;  %vm941_vm15 = vmor %vm939_vm12, %vm940_vm10  ;;  %vm970_vm2 = vweird.f32 %v2431_v55  ;;  %v991_v54 = vor.u32 1.1754944e-38, %v990_v40 }
 0x25f   : > { %v980_v63 = vmul.f32 %v2433_v58, %v3299_v47  ;;  %v936_v0 = vsub.f32 1.0, %v935_v56  ;;  %vm985_vm5 = vweird.f32 %v2433_v58  ;;  %vm971_vm7 = vmor %vm969_vm6, %vm970_vm2  ;;  %vm974_vm10 = vcmp.eq.f32.partialorder %v973_v39, 8.507059e+37 }
 0x260   : > { %v966_v3 = vsub.f32 1.0, %v965_v49  ;;  %v922_v5 = vmul.f32 %v2427_v51, %v921_v59  ;;  %vm986_vm9 = vmor %vm984_vm8, %vm985_vm5  ;;  %vm989_vm11 = vcmp.eq.f32.partialorder %v988_v44, 8.507059e+37  ;;  %v1009_v47 = vrot.slane %v3269_v9, 7 }
 0x261   : > { %v981_v60 = vsub.f32 1.0, %v980_v63  ;;  %v937_v11 = vmul.f32 %v2429_v52, %v936_v0  ;;  %vm1017_vm12 = vcmask 256002  }
 0x262   : > { %v967_v25 = vmul.f32 %v2431_v55, %v966_v3  ;;  %v923_v15 = vadd.f32 %v2427_v51, %v922_v5 }
 0x263   : > { %v982_v20 = vmul.f32 %v2433_v58, %v981_v60  ;;  %v938_v26 = vadd.f32 %v2429_v52, %v937_v11 }
 0x264   : > { %v927_v28 = vsel %vm926_vm13, %v2427_v51, %v923_v15  ;;  %v968_v30 = vadd.f32 %v2431_v55, %v967_v25  ;;  %v976_v51 = vor.u32 1.1754944e-38, %v975_v18 }
 0x265   : > { %v932_v32 = vsel %vm929_vm14, %v931_v12, %v927_v28  ;;  %v942_v33 = vsel %vm941_vm15, %v2429_v52, %v938_v26  ;;  %v983_v34 = vadd.f32 %v2433_v58, %v982_v20 }
 0x266   : > { %v947_v36 = vsel %vm944_vm0, %v946_v29, %v942_v33  ;;  %v999_v37 = vmul.f32 %v995_v57, %v932_v32  ;;  %v972_v48 = vsel %vm971_vm7, %v2431_v55, %v968_v30 }
 0x267   : > { %v1000_v43 = vmul.f32 %v996_v22, %v947_v36  ;;  %v987_v52 = vsel %vm986_vm9, %v2433_v58, %v983_v34  ;;  %v977_v46 = vsel %vm974_vm10, %v976_v51, %v972_v48 }
 0x268   : > { %v1001_v45 = vadd.f32 %v999_v37, %v3187_v14  ;;  %v992_v56 = vsel %vm989_vm11, %v991_v54, %v987_v52  ;;  %v1005_v49 = vsub.f32 1.0, %v977_v46  ;;  %v1013_v53 = vmul.f32 %v1009_v47, %v977_v46 }
 0x269   : > { %v1002_v50 = vadd.f32 %v1000_v43, %v3189_v35  ;;  %v1006_v55 = vsub.f32 1.0, %v992_v56  ;;  %v1014_v0 = vmul.f32 %v1010_v62, %v992_v56 }
 0x26a   : > { %2434 = vtanh.f32 %v1001_v45 }
 0x26b   : > { %2436 = vtanh.f32 %v1002_v50 }
 0x270   : > { %v2435_v59 = vpop.eup %2434 }
 0x271   : > { %v2437_v57 = vpop.eup %2436  ;;  %v1007_v63 = vmul.f32 %v2435_v59, %v1005_v49 }
 0x272   : > { %v1008_v58 = vmul.f32 %v2437_v57, %v1006_v55 }
 0x273   : > { %v3316_v1 = vadd.f32 %v1013_v53, %v1007_v63 }
 0x274   : > { %v3318_v3 = vadd.f32 %v1014_v0, %v1008_v58 }
 0x275   : > { %1018 = vst.msk [vmem:[%s3077_s19] sm:$0x4] %vm1017_vm12, %v3316_v1  ;;  %v1022_v5 = vrot.slane %v3316_v1, 2 }
 0x276   : > { %1019 = vst.msk [vmem:[%s3077_s19 + $0x8] sm:$0x4] %vm1017_vm12, %v3318_v3  ;;  %v1023_v9 = vrot.slane %v3318_v3, 1 }
 0x278   : > { %v1024_v8 = vsel %vm662_vm4, %v1023_v9, %v1022_v5 }
 0x279   : > { %2181 = vmatmul.msk.f32.vlgmr.msrb.gmra.mxu3 %vm369_vm1, %v1024_v8  ;;  %2182 = vmatmul.msk.f32.vlgmr.msrb.gmra.mxu0 %vm369_vm1, %v1024_v8 }
 0x27a   : > { %2183 = vmatmul.msk.f32.vlgmr.msrb.gmra.mxu1 %vm369_vm1, %v1024_v8  ;;  %1445 = vmatpush.msrb.mxu3 %v3099_v16 }
 0x27b   : > { %1588 = vmatpush.msrb.mxu0 %v3082_v2  ;;  %1608 = vmatpush.msrb.mxu1 %v3096_v13 }
 0x27c   : > { %1446 = vmatpush.msrb.mxu3 %v3110_v21 }
 0x27d   : > { %1589 = vmatpush.msrb.mxu0 %v3085_v4  ;;  %1609 = vmatpush.msrb.mxu1 %v3104_v17 }
 0x27e   : > { %1447 = vmatpush.msrb.mxu3 %v3116_v24 }
 0x27f   : > { %1590 = vmatpush.msrb.mxu0 %v3087_v6  ;;  %1610 = vmatpush.msrb.mxu1 %v3106_v19 }
 0x280   : > { %1448 = vmatpush.msrb.mxu3 %v3121_v27 }
 0x281   : > { %1591 = vmatpush.msrb.mxu0 %v3090_v10  ;;  %1611 = vmatpush.msrb.mxu1 %v3114_v23 }
 0x2f6   : > { %v1064_v2 = vpop.f32.mrf.mxu0 }
 0x2f7   : > { %v1133_v13 = vrot.slane %v1064_v2, 5  ;;  %v1134_v16 = vrot.slane %v1064_v2, 6  ;;  %v1084_v30 = vpop.f32.mrf.mxu1 }
 0x2f8   : > { %v1085_v36 = vadd.f32 %v3183_v61, %v1084_v30 }
 0x2f9   : > { %v1137_v21 = vadd.f32 %v1133_v13, %v3172_v41  ;;  %v1138_v4 = vadd.f32 %v1134_v16, %v3174_v42 }
 0x2fa   : > { %v1178_v48 = vrot.slane %v1085_v36, 5  ;;  %v1179_v59 = vrot.slane %v1085_v36, 6  ;;  %v2539_v36 = vld [vmem:[#allocation8 + $0x18] sm:$0xff] }
 0x2fb   : > { %v2186_v17 = vmul.f32 -1.442695, %v1137_v21  ;;  %v2187_v7 = vmul.f32 -1.442695, %v1138_v4 }
 0x2fc   : > { %v1044_v24 = vpop.f32.mrf.mxu3 }
 0x2fd   : > { %2438 = vpow2.f32 %v2186_v17  ;;  %v1088_v6 = vrot.slane %v1044_v24, 5  ;;  %v1089_v60 = vrot.slane %v1044_v24, 6 }
 0x2fe   : > { %2440 = vpow2.f32 %v2187_v7 }
 0x2ff   : > { %v1092_v19 = vadd.f32 %v1088_v6, %v3166_v31  ;;  %v1093_v10 = vadd.f32 %v1089_v60, %v3169_v38 }
 0x301   : > { %v2184_v27 = vmul.f32 -1.442695, %v1092_v19  ;;  %v2185_v23 = vmul.f32 -1.442695, %v1093_v10 }
 0x303   : > { %v2439_v11 = vpop.eup %2438  ;;  %2442 = vpow2.f32 %v2184_v27 }
 0x304   : > { %v2441_v22 = vpop.eup %2440  ;;  %v3346_v25 = vadd.f32 1.0, %v2439_v11  ;;  %2444 = vpow2.f32 %v2185_v23 }
 0x305   : > { %v3348_v15 = vadd.f32 1.0, %v2441_v22  ;;  %v1192_v22 = vrot.slane %v3316_v1, 7 }
 0x306   : > { %2446 = vrcp.f32 %v3346_v25  ;;  %v1158_v55 = vand.u32 2147483648, %v3346_v25  ;;  %vm1152_vm10 = vweird.f32 %v3346_v25  ;;  %v1156_v16 = vand.u32 2147483647, %v3346_v25 }
 0x307   : > { %2448 = vrcp.f32 %v3348_v15  ;;  %v1173_v21 = vand.u32 2147483648, %v3348_v15  ;;  %vm1167_vm12 = vweird.f32 %v3348_v15  ;;  %v1171_v17 = vand.u32 2147483647, %v3348_v15 }
 0x308   : > { %v1159_v60 = vor.u32 1.1754944e-38, %v1158_v55 }
 0x309   : > { %v2443_v18 = vpop.eup %2442  ;;  %v1174_v10 = vor.u32 1.1754944e-38, %v1173_v21 }
 0x30a   : > { %v2445_v20 = vpop.eup %2444  ;;  %v1100_v12 = vadd.f32 1.0, %v2443_v18  ;;  %v1193_v18 = vrot.slane %v3318_v3, 7 }
 0x30b   : > { %v1101_v26 = vadd.f32 1.0, %v2445_v20 }
 0x30c   : > { %2450 = vrcp.f32 %v1100_v12  ;;  %v3352_v28 = vpop.eup %2446  ;;  %v1113_v50 = vand.u32 2147483648, %v1100_v12  ;;  %v1111_v54 = vand.u32 2147483647, %v1100_v12  ;;  %vm1107_vm15 = vweird.f32 %v1100_v12 }
 0x30d   : > { %2452 = vrcp.f32 %v1101_v26  ;;  %v3354_v29 = vpop.eup %2448  ;;  %v1148_v32 = vmul.f32 %v3352_v28, %v3346_v25  ;;  %v1128_v46 = vand.u32 2147483648, %v1101_v26  ;;  %v1126_v47 = vand.u32 2147483647, %v1101_v26 }
 0x30e   : > { %v1163_v33 = vmul.f32 %v3354_v29, %v3348_v15  ;;  %v1114_v57 = vor.u32 1.1754944e-38, %v1113_v50  ;;  %vm1122_vm2 = vweird.f32 %v1101_v26  ;;  %vm1153_vm5 = vweird.f32 %v3352_v28  ;;  %v3404_v50 = vld [vmem:[#allocation8 + $0x40] sm:$0xff] }
 0x30f   : > { %v1149_v40 = vsub.f32 1.0, %v1148_v32  ;;  %vm1112_vm6 = vcmp.eq.f32.partialorder %v1111_v54, 8.507059e+37  ;;  %v1129_v58 = vor.u32 1.1754944e-38, %v1128_v46  ;;  %vm1127_vm8 = vcmp.eq.f32.partialorder %v1126_v47, 8.507059e+37  ;;  %vm1154_vm11 = vmor %vm1152_vm10, %vm1153_vm5 }
 0x310   : > { %v1164_v44 = vsub.f32 1.0, %v1163_v33  ;;  %vm1168_vm9 = vweird.f32 %v3354_v29 }
 0x311   : > { %v1150_v56 = vmul.f32 %v3352_v28, %v1149_v40  ;;  %v2542_v40 = vld [vmem:[#allocation8 + $0x10] sm:$0xff] }
 0x312   : > { %v2451_v34 = vpop.eup %2450  ;;  %v1165_v61 = vmul.f32 %v3354_v29, %v1164_v44  ;;  %v3401_v44 = vld [vmem:[#allocation8 + $0x48] sm:$0xff] }
 0x313   : > { %v2453_v37 = vpop.eup %2452  ;;  %v1103_v39 = vmul.f32 %v2451_v34, %v1100_v12  ;;  %vm1108_vm13 = vweird.f32 %v2451_v34  ;;  %v1151_v0 = vadd.f32 %v3352_v28, %v1150_v56 }
 0x314   : > { %v1118_v43 = vmul.f32 %v2453_v37, %v1101_v26  ;;  %vm1123_vm14 = vweird.f32 %v2453_v37  ;;  %vm1109_vm0 = vmor %vm1107_vm15, %vm1108_vm13  ;;  %v1166_v8 = vadd.f32 %v3354_v29, %v1165_v61  ;;  %vm1172_vm15 = vcmp.eq.f32.partialorder %v1171_v17, 8.507059e+37 }
 0x315   : > { %v1104_v45 = vsub.f32 1.0, %v1103_v39  ;;  %vm1124_vm7 = vmor %vm1122_vm2, %vm1123_vm14  ;;  %v1155_v24 = vsel %vm1154_vm11, %v3352_v28, %v1151_v0  ;;  %vm1157_vm14 = vcmp.eq.f32.partialorder %v1156_v16, 8.507059e+37  ;;  %v3398_v39 = vld [vmem:[#allocation8 + $0x50] sm:$0xff] }
 0x316   : > { %v1119_v51 = vsub.f32 1.0, %v1118_v43  ;;  %vm1169_vm13 = vmor %vm1167_vm12, %vm1168_vm9  ;;  %v1160_v27 = vsel %vm1157_vm14, %v1159_v60, %v1155_v24  ;;  %v2543_v43 = vld [vmem:[#allocation8 + $0x30] sm:$0xff] }
 0x317   : > { %v1105_v52 = vmul.f32 %v2451_v34, %v1104_v45  ;;  %v1170_v19 = vsel %vm1169_vm13, %v3354_v29, %v1166_v8  ;;  %v1188_v11 = vsub.f32 1.0, %v1160_v27  ;;  %v1196_v26 = vmul.f32 %v1192_v22, %v1160_v27  ;;  %v2545_v45 = vld [vmem:[#allocation8 + $0x8] sm:$0xff] }
 0x318   : > { %v1120_v49 = vmul.f32 %v2453_v37, %v1119_v51  ;;  %v1175_v23 = vsel %vm1172_vm15, %v1174_v10, %v1170_v19  ;;  %v2548_v51 = vld [vmem:[#allocation8] sm:$0xff] }
 0x319   : > { %v1106_v62 = vadd.f32 %v2451_v34, %v1105_v52  ;;  %v1189_v15 = vsub.f32 1.0, %v1175_v23  ;;  %v1197_v29 = vmul.f32 %v1193_v18, %v1175_v23  ;;  %v2549_v52 = vld [vmem:[#allocation8 + $0x20] sm:$0xff] }
 0x31a   : > { %v1121_v63 = vadd.f32 %v2453_v37, %v1120_v49 }
 0x31b   : > { %v1110_v53 = vsel %vm1109_vm0, %v2451_v34, %v1106_v62  ;;  %vm1200_vm0 = vcmask 257027   ;;  %v3395_v34 = vld [vmem:[#allocation8 + $0x58] sm:$0xff] }
 0x31c   : > { %v1115_v5 = vsel %vm1112_vm6, %v1114_v57, %v1110_v53  ;;  %v1125_v9 = vsel %vm1124_vm7, %v2453_v37, %v1121_v63  ;;  %v2540_v37 = vld [vmem:[#allocation8 + $0x38] sm:$0xff] }
 0x31d   : > { %v1130_v2 = vsel %vm1127_vm8, %v1129_v58, %v1125_v9  ;;  %v1182_v13 = vmul.f32 %v1178_v48, %v1115_v5  ;;  %v2546_v48 = vld [vmem:[#allocation8 + $0x28] sm:$0xff] }
 0x31e   : > { %v1183_v4 = vmul.f32 %v1179_v59, %v1130_v2 }
 0x31f   : > { %v1184_v7 = vadd.f32 %v1182_v13, %v3187_v14 }
 0x320   : > { %v1185_v6 = vadd.f32 %v1183_v4, %v3189_v35 }
 0x321   : > { %2454 = vtanh.f32 %v1184_v7  ;;  %v3419_v7 = vld [vmem:[%s3714_s2] ss:$0 sm:$0xff] }
 0x322   : > { %2456 = vtanh.f32 %v1185_v6 }
 0x327   : > { %v2455_v25 = vpop.eup %2454 }
 0x328   : > { %v2457_v20 = vpop.eup %2456  ;;  %v1190_v12 = vmul.f32 %v2455_v25, %v1188_v11 }
 0x329   : > { %v1191_v28 = vmul.f32 %v2457_v20, %v1189_v15 }
 0x32a   : > { %v3381_v30 = vadd.f32 %v1196_v26, %v1190_v12 }
 0x32b   : > { %v3383_v32 = vadd.f32 %v1197_v29, %v1191_v28 }
 0x32c   : > { %1201 = vst.msk [vmem:[%s3077_s19] sm:$0x8] %vm1200_vm0, %v3381_v30  ;;  %v1205_v33 = vrot.slane %v3381_v30, 3 }
 0x32d   : > { %1202 = vst.msk [vmem:[%s3077_s19 + $0x8] sm:$0x8] %vm1200_vm0, %v3383_v32  ;;  %v1206_v1 = vrot.slane %v3383_v32, 2 }
 0x32f   : > { %v1207_v3 = vsel %vm662_vm4, %v1206_v1, %v1205_v33 }
 0x330   : > { %2188 = vmatmul.msk.f32.vlgmr.msrb.gmra.mxu2 %vm369_vm1, %v1207_v3  ;;  %2189 = vmatmul.msk.f32.vlgmr.msra.gmra.mxu3 %vm369_vm1, %v1207_v3 }
 0x331   : > { %2190 = vmatmul.msk.f32.vlgmr.msra.gmra.mxu0 %vm369_vm1, %v1207_v3  ;;  %1628 = vmatpush.msrb.mxu2 %v3395_v34 }
 0x332   : > { %1771 = vmatpush.msra.mxu3 %v2539_v36  ;;  %1791 = vmatpush.msra.mxu0 %v2540_v37 }
 0x333   : > { %1629 = vmatpush.msrb.mxu2 %v3398_v39 }
 0x334   : > { %1772 = vmatpush.msra.mxu3 %v2542_v40  ;;  %1792 = vmatpush.msra.mxu0 %v2543_v43 }
 0x335   : > { %1630 = vmatpush.msrb.mxu2 %v3401_v44 }
 0x336   : > { %1773 = vmatpush.msra.mxu3 %v2545_v45  ;;  %1793 = vmatpush.msra.mxu0 %v2546_v48 }
 0x337   : > { %1631 = vmatpush.msrb.mxu2 %v3404_v50 }
 0x338   : > { %1774 = vmatpush.msra.mxu3 %v2548_v51  ;;  %1794 = vmatpush.msra.mxu0 %v2549_v52 }
 0x3ae   : > { %v1267_v21 = vpop.f32.mrf.mxu0 }
 0x3af   : > { %v1268_v24 = vadd.f32 %v3419_v7, %v1267_v21  ;;  %v1375_v21 = vrot.slane %v3381_v30, 7 }
 0x3b1   : > { %v1361_v27 = vrot.slane %v1268_v24, 4  ;;  %v1362_v15 = vrot.slane %v1268_v24, 5  ;;  %v1376_v24 = vrot.slane %v3383_v32, 7 }
 0x3b3   : > { %v1227_v54 = vpop.f32.mrf.mxu2  ;;  %v1247_v46 = vpop.f32.mrf.mxu3 }
 0x3b4   : > { %v1271_v56 = vrot.slane %v1227_v54, 4  ;;  %v1272_v49 = vrot.slane %v1227_v54, 5  ;;  %v1316_v47 = vrot.slane %v1247_v46, 4  ;;  %v1317_v61 = vrot.slane %v1247_v46, 5 }
 0x3b6   : > { %v1275_v59 = vadd.f32 %v1271_v56, %v3166_v31  ;;  %v1276_v62 = vadd.f32 %v1272_v49, %v3169_v38  ;;  %v1320_v55 = vadd.f32 %v1316_v47, %v3172_v41  ;;  %v1321_v57 = vadd.f32 %v1317_v61, %v3174_v42 }
 0x3b8   : > { %v2191_v63 = vmul.f32 -1.442695, %v1275_v59  ;;  %v2192_v53 = vmul.f32 -1.442695, %v1276_v62  ;;  %v2193_v58 = vmul.f32 -1.442695, %v1320_v55 }
 0x3b9   : > { %v2194_v0 = vmul.f32 -1.442695, %v1321_v57 }
 0x3ba   : > { %2458 = vpow2.f32 %v2191_v63 }
 0x3bb   : > { %2460 = vpow2.f32 %v2192_v53 }
 0x3bc   : > { %2462 = vpow2.f32 %v2193_v58 }
 0x3bd   : > { %2464 = vpow2.f32 %v2194_v0 }
 0x3c0   : > { %v2459_v5 = vpop.eup %2458 }
 0x3c1   : > { %v2461_v9 = vpop.eup %2460  ;;  %v1283_v8 = vadd.f32 1.0, %v2459_v5 }
 0x3c2   : > { %v2463_v2 = vpop.eup %2462  ;;  %v1284_v13 = vadd.f32 1.0, %v2461_v9 }
 0x3c3   : > { %v2465_v16 = vpop.eup %2464  ;;  %2466 = vrcp.f32 %v1283_v8  ;;  %v3411_v4 = vadd.f32 1.0, %v2463_v2  ;;  %v1294_v11 = vand.u32 2147483647, %v1283_v8  ;;  %v1296_v22 = vand.u32 2147483648, %v1283_v8 }
 0x3c4   : > { %2468 = vrcp.f32 %v1284_v13  ;;  %v3413_v17 = vadd.f32 1.0, %v2465_v16  ;;  %v1309_v20 = vand.u32 2147483647, %v1284_v13  ;;  %v1311_v12 = vand.u32 2147483648, %v1284_v13 }
 0x3c5   : > { %2470 = vrcp.f32 %v3411_v4  ;;  %vm1290_vm2 = vweird.f32 %v1283_v8  ;;  %vm1305_vm6 = vweird.f32 %v1284_v13  ;;  %vm1295_vm8 = vcmp.eq.f32.partialorder %v1294_v11, 8.507059e+37 }
 0x3c6   : > { %2472 = vrcp.f32 %v3413_v17  ;;  %v1297_v36 = vor.u32 1.1754944e-38, %v1296_v22  ;;  %vm1310_vm10 = vcmp.eq.f32.partialorder %v1309_v20, 8.507059e+37  ;;  %v1312_v43 = vor.u32 1.1754944e-38, %v1311_v12 }
 0x3c7   : > { %vm1335_vm12 = vweird.f32 %v3411_v4  ;;  %v1341_v52 = vand.u32 2147483648, %v3411_v4  ;;  %v1339_v62 = vand.u32 2147483647, %v3411_v4  ;;  %v1356_v57 = vand.u32 2147483648, %v3413_v17 }
 0x3c8   : > { %vm1350_vm0 = vweird.f32 %v3413_v17  ;;  %v1354_v63 = vand.u32 2147483647, %v3413_v17 }
 0x3c9   : > { %v2467_v6 = vpop.eup %2466  ;;  %v1342_v5 = vor.u32 1.1754944e-38, %v1341_v52 }
 0x3ca   : > { %v2469_v60 = vpop.eup %2468  ;;  %v1286_v19 = vmul.f32 %v2467_v6, %v1283_v8  ;;  %vm1291_vm5 = vweird.f32 %v2467_v6  ;;  %v1357_v8 = vor.u32 1.1754944e-38, %v1356_v57 }
 0x3cb   : > { %v1301_v10 = vmul.f32 %v2469_v60, %v1284_v13  ;;  %v2471_v25 = vpop.eup %2470  ;;  %vm1306_vm7 = vweird.f32 %v2469_v60  ;;  %vm1292_vm9 = vmor %vm1290_vm2, %vm1291_vm5  ;;  %vm1340_vm5 = vcmp.eq.f32.partialorder %v1339_v62, 8.507059e+37 }
 0x3cc   : > { %v1287_v23 = vsub.f32 1.0, %v1286_v19  ;;  %v2473_v26 = vpop.eup %2472  ;;  %v1331_v29 = vmul.f32 %v2471_v25, %v3411_v4  ;;  %vm1307_vm11 = vmor %vm1305_vm6, %vm1306_vm7  ;;  %vm1336_vm13 = vweird.f32 %v2471_v25  ;;  %vm1355_vm6 = vcmp.eq.f32.partialorder %v1354_v63, 8.507059e+37 }
 0x3cd   : > { %v1302_v18 = vsub.f32 1.0, %v1301_v10  ;;  %v1346_v1 = vmul.f32 %v2473_v26, %v3413_v17  ;;  %vm1351_vm14 = vweird.f32 %v2473_v26  ;;  %vm1337_vm15 = vmor %vm1335_vm12, %vm1336_vm13  ;;  %vm1383_vm7 = vcmask 258052  }
 0x3ce   : > { %v1288_v28 = vmul.f32 %v2467_v6, %v1287_v23  ;;  %v1332_v37 = vsub.f32 1.0, %v1331_v29  ;;  %vm1352_vm2 = vmor %vm1350_vm0, %vm1351_vm14 }
 0x3cf   : > { %v1303_v33 = vmul.f32 %v2469_v60, %v1302_v18  ;;  %v1347_v45 = vsub.f32 1.0, %v1346_v1 }
 0x3d0   : > { %v1289_v3 = vadd.f32 %v2467_v6, %v1288_v28  ;;  %v1333_v51 = vmul.f32 %v2471_v25, %v1332_v37 }
 0x3d1   : > { %v1304_v40 = vadd.f32 %v2469_v60, %v1303_v33  ;;  %v1348_v56 = vmul.f32 %v2473_v26, %v1347_v45 }
 0x3d2   : > { %v1293_v48 = vsel %vm1292_vm9, %v2467_v6, %v1289_v3  ;;  %v1334_v61 = vadd.f32 %v2471_v25, %v1333_v51 }
 0x3d3   : > { %v1298_v54 = vsel %vm1295_vm8, %v1297_v36, %v1293_v48  ;;  %v1308_v46 = vsel %vm1307_vm11, %v2469_v60, %v1304_v40  ;;  %v1349_v55 = vadd.f32 %v2473_v26, %v1348_v56 }
 0x3d4   : > { %v1313_v49 = vsel %vm1310_vm10, %v1312_v43, %v1308_v46  ;;  %v1365_v47 = vmul.f32 %v1361_v27, %v1298_v54  ;;  %v1338_v58 = vsel %vm1337_vm15, %v2471_v25, %v1334_v61 }
 0x3d5   : > { %v1366_v59 = vmul.f32 %v1362_v15, %v1313_v49  ;;  %v1353_v9 = vsel %vm1352_vm2, %v2473_v26, %v1349_v55  ;;  %v1343_v2 = vsel %vm1340_vm5, %v1342_v5, %v1338_v58 }
 0x3d6   : > { %v1367_v53 = vadd.f32 %v1365_v47, %v3187_v14  ;;  %v1358_v13 = vsel %vm1355_vm6, %v1357_v8, %v1353_v9  ;;  %v1371_v16 = vsub.f32 1.0, %v1343_v2  ;;  %v1379_v19 = vmul.f32 %v1375_v21, %v1343_v2 }
 0x3d7   : > { %v1368_v0 = vadd.f32 %v1366_v59, %v3189_v35  ;;  %v1372_v17 = vsub.f32 1.0, %v1358_v13  ;;  %v1380_v27 = vmul.f32 %v1376_v24, %v1358_v13 }
 0x3d8   : > { %2474 = vtanh.f32 %v1367_v53 }
 0x3d9   : > { %2476 = vtanh.f32 %v1368_v0 }
 0x3de   : > { %v2475_v4 = vpop.eup %2474 }
 0x3df   : > { %v2477_v6 = vpop.eup %2476  ;;  %v1373_v60 = vmul.f32 %v2475_v4, %v1371_v16 }
 0x3e0   : > { %v1374_v10 = vmul.f32 %v2477_v6, %v1372_v17 }
 0x3e1   : > { %v3435_v23 = vadd.f32 %v1379_v19, %v1373_v60 }
 0x3e2   : > { %v3437_v11 = vadd.f32 %v1380_v27, %v1374_v10 }
 0x3e3   : > { %1384 = vst.msk [vmem:[%s3077_s19] sm:$0x10] %vm1383_vm7, %v3435_v23  ;;  %v1388_v22 = vrot.slane %v3435_v23, 4 }
 0x3e4   : > { %1385 = vst.msk [vmem:[%s3077_s19 + $0x8] sm:$0x10] %vm1383_vm7, %v3437_v11  ;;  %v1389_v30 = vrot.slane %v3437_v11, 3 }
 0x3e6   : > { %v1390_v32 = vsel %vm662_vm4, %v1389_v30, %v1388_v22 }
 0x3e7   : > { %2195 = vmatmul.msk.f32.vlgmr.msra.gmra.mxu1 %vm369_vm1, %v1390_v32  ;;  %2196 = vmatmul.msk.f32.vlgmr.msra.gmra.mxu2 %vm369_vm1, %v1390_v32 }
 0x3e8   : > { %2197 = vmatmul.msk.f32.vlgmr.msrb.gmra.mxu3 %vm369_vm1, %v1390_v32  ;;  %1811 = vmatpush.msra.mxu1 %v3395_v34 }
 0x3ea   : > { %1812 = vmatpush.msra.mxu1 %v3398_v39 }
 0x3ec   : > { %1813 = vmatpush.msra.mxu1 %v3401_v44 }
 0x3ee   : > { %1814 = vmatpush.msra.mxu1 %v3404_v50 }
 0x464   : > { %v1410_v25 = vpop.f32.mrf.mxu1 }
 0x465   : > { %v1454_v15 = vrot.slane %v1410_v25, 3  ;;  %v1455_v18 = vrot.slane %v1410_v25, 4 }
 0x467   : > { %v1458_v20 = vadd.f32 %v1454_v15, %v3166_v31  ;;  %v1459_v12 = vadd.f32 %v1455_v18, %v3169_v38 }
 0x469   : > { %v2198_v26 = vmul.f32 -1.442695, %v1458_v20  ;;  %v2199_v28 = vmul.f32 -1.442695, %v1459_v12 }
 0x46a   : > { %v1430_v29 = vpop.f32.mrf.mxu2 }
 0x46b   : > { %2478 = vpow2.f32 %v2198_v26  ;;  %v1499_v33 = vrot.slane %v1430_v29, 3  ;;  %v1500_v1 = vrot.slane %v1430_v29, 4  ;;  %v1450_v51 = vpop.f32.mrf.mxu3 }
 0x46c   : > { %2480 = vpow2.f32 %v2199_v28  ;;  %v1451_v56 = vadd.f32 %v3419_v7, %v1450_v51 }
 0x46d   : > { %v1503_v34 = vadd.f32 %v1499_v33, %v3172_v41  ;;  %v1504_v39 = vadd.f32 %v1500_v1, %v3174_v42 }
 0x46e   : > { %v1544_v53 = vrot.slane %v1451_v56, 3  ;;  %v1545_v9 = vrot.slane %v1451_v56, 4 }
 0x46f   : > { %v2200_v44 = vmul.f32 -1.442695, %v1503_v34  ;;  %v2201_v50 = vmul.f32 -1.442695, %v1504_v39 }
 0x471   : > { %v2479_v3 = vpop.eup %2478  ;;  %2482 = vpow2.f32 %v2200_v44 }
 0x472   : > { %v2481_v36 = vpop.eup %2480  ;;  %v1466_v37 = vadd.f32 1.0, %v2479_v3  ;;  %2484 = vpow2.f32 %v2201_v50 }
 0x473   : > { %v1467_v40 = vadd.f32 1.0, %v2481_v36 }
 0x474   : > { %2486 = vrcp.f32 %v1466_v37  ;;  %v1477_v61 = vand.u32 2147483647, %v1466_v37  ;;  %v1479_v62 = vand.u32 2147483648, %v1466_v37  ;;  %vm1473_vm10 = vweird.f32 %v1466_v37 }
 0x475   : > { %2488 = vrcp.f32 %v1467_v40  ;;  %v1492_v57 = vand.u32 2147483647, %v1467_v40  ;;  %v1494_v63 = vand.u32 2147483648, %v1467_v40  ;;  %vm1488_vm12 = vweird.f32 %v1467_v40 }
 0x476   : > { %vm3465_vm11 = vcmp.eq.f32.partialorder %v1477_v61, 8.507059e+37  ;;  %v1480_v4 = vor.u32 1.1754944e-38, %v1479_v62 }
 0x477   : > { %v2483_v43 = vpop.eup %2482  ;;  %vm1493_vm0 = vcmp.eq.f32.partialorder %v1492_v57, 8.507059e+37  ;;  %v1495_v6 = vor.u32 1.1754944e-38, %v1494_v63 }
 0x478   : > { %v2485_v45 = vpop.eup %2484  ;;  %v3457_v48 = vadd.f32 1.0, %v2483_v43 }
 0x479   : > { %v3459_v52 = vadd.f32 1.0, %v2485_v45 }
 0x47a   : > { %v2487_v54 = vpop.eup %2486  ;;  %2490 = vrcp.f32 %v3457_v48  ;;  %vm1518_vm14 = vweird.f32 %v3457_v48  ;;  %v1524_v60 = vand.u32 2147483648, %v3457_v48  ;;  %v1522_v12 = vand.u32 2147483647, %v3457_v48 }
 0x47b   : > { %v2489_v46 = vpop.eup %2488  ;;  %2492 = vrcp.f32 %v3459_v52  ;;  %v1469_v49 = vmul.f32 %v2487_v54, %v1466_v37  ;;  %vm1474_vm8 = vweird.f32 %v2487_v54  ;;  %vm1533_vm6 = vweird.f32 %v3459_v52 }
 0x47c   : > { %v1484_v47 = vmul.f32 %v2489_v46, %v1467_v40  ;;  %vm1489_vm9 = vweird.f32 %v2489_v46  ;;  %vm1475_vm13 = vmor %vm1473_vm10, %vm1474_vm8  ;;  %v1539_v26 = vand.u32 2147483648, %v3459_v52  ;;  %v1537_v29 = vand.u32 2147483647, %v3459_v52 }
 0x47d   : > { %v1470_v59 = vsub.f32 1.0, %v1469_v49  ;;  %vm1490_vm15 = vmor %vm1488_vm12, %vm1489_vm9  ;;  %v1525_v39 = vor.u32 1.1754944e-38, %v1524_v60  ;;  %vm1523_vm9 = vcmp.eq.f32.partialorder %v1522_v12, 8.507059e+37  ;;  %v1558_v40 = vrot.slane %v3435_v23, 7 }
 0x47e   : > { %v1485_v55 = vsub.f32 1.0, %v1484_v47  ;;  %v1540_v50 = vor.u32 1.1754944e-38, %v1539_v26  ;;  %vm1538_vm10 = vcmp.eq.f32.partialorder %v1537_v29, 8.507059e+37 }
 0x47f   : > { %v1471_v0 = vmul.f32 %v2487_v54, %v1470_v59 }
 0x480   : > { %v2491_v58 = vpop.eup %2490  ;;  %v1486_v5 = vmul.f32 %v2489_v46, %v1485_v55 }
 0x481   : > { %v2493_v8 = vpop.eup %2492  ;;  %v1514_v2 = vmul.f32 %v2491_v58, %v3457_v48  ;;  %v1472_v21 = vadd.f32 %v2487_v54, %v1471_v0  ;;  %vm1519_vm2 = vweird.f32 %v2491_v58  ;;  %v1559_v48 = vrot.slane %v3437_v11, 7 }
 0x482   : > { %v1529_v16 = vmul.f32 %v2493_v8, %v3459_v52  ;;  %v1487_v17 = vadd.f32 %v2489_v46, %v1486_v5  ;;  %vm1534_vm5 = vweird.f32 %v2493_v8  ;;  %vm1520_vm7 = vmor %vm1518_vm14, %vm1519_vm2 }
 0x483   : > { %v1515_v24 = vsub.f32 1.0, %v1514_v2  ;;  %v1476_v10 = vsel %vm1475_vm13, %v2487_v54, %v1472_v21  ;;  %vm1535_vm8 = vmor %vm1533_vm6, %vm1534_vm5 }
 0x484   : > { %v1530_v19 = vsub.f32 1.0, %v1529_v16  ;;  %v1491_v27 = vsel %vm1490_vm15, %v2489_v46, %v1487_v17  ;;  %v1481_v30 = vsel %vm3465_vm11, %v1480_v4, %v1476_v10  ;;  %vm1566_vm11 = vcmask 259077  }
 0x485   : > { %v1516_v22 = vmul.f32 %v2491_v58, %v1515_v24  ;;  %v1496_v32 = vsel %vm1493_vm0, %v1495_v6, %v1491_v27  ;;  %v1548_v15 = vmul.f32 %v1544_v53, %v1481_v30 }
 0x486   : > { %v1531_v25 = vmul.f32 %v2493_v8, %v1530_v19  ;;  %v1549_v18 = vmul.f32 %v1545_v9, %v1496_v32 }
 0x487   : > { %v1517_v20 = vadd.f32 %v2491_v58, %v1516_v22  ;;  %v1550_v33 = vadd.f32 %v1548_v15, %v3187_v14 }
 0x488   : > { %v1532_v28 = vadd.f32 %v2493_v8, %v1531_v25  ;;  %v1551_v1 = vadd.f32 %v1549_v18, %v3189_v35 }
 0x489   : > { %v1521_v34 = vsel %vm1520_vm7, %v2491_v58, %v1517_v20  ;;  %2494 = vtanh.f32 %v1550_v33 }
 0x48a   : > { %v1536_v44 = vsel %vm1535_vm8, %v2493_v8, %v1532_v28  ;;  %2496 = vtanh.f32 %v1551_v1  ;;  %v1526_v3 = vsel %vm1523_vm9, %v1525_v39, %v1521_v34 }
 0x48b   : > { %v1541_v36 = vsel %vm1538_vm10, %v1540_v50, %v1536_v44  ;;  %v1554_v37 = vsub.f32 1.0, %v1526_v3  ;;  %v1562_v54 = vmul.f32 %v1558_v40, %v1526_v3 }
 0x48c   : > { %v1555_v45 = vsub.f32 1.0, %v1541_v36  ;;  %v1563_v56 = vmul.f32 %v1559_v48, %v1541_v36 }
 0x48f   : > { %v2495_v43 = vpop.eup %2494 }
 0x490   : > { %v2497_v51 = vpop.eup %2496  ;;  %v1556_v52 = vmul.f32 %v2495_v43, %v1554_v37 }
 0x491   : > { %v1557_v46 = vmul.f32 %v2497_v51, %v1555_v45 }
 0x492   : > { %v3485_v49 = vadd.f32 %v1562_v54, %v1556_v52 }
 0x493   : > { %v3487_v47 = vadd.f32 %v1563_v56, %v1557_v46 }
 0x494   : > { %1567 = vst.msk [vmem:[%s3077_s19] sm:$0x20] %vm1566_vm11, %v3485_v49  ;;  %v1571_v61 = vrot.slane %v3485_v49, 5 }
 0x495   : > { %1568 = vst.msk [vmem:[%s3077_s19 + $0x8] sm:$0x20] %vm1566_vm11, %v3487_v47  ;;  %v1572_v23 = vrot.slane %v3487_v47, 4 }
 0x497   : > { %v1573_v11 = vsel %vm662_vm4, %v1572_v23, %v1571_v61 }
 0x498   : > { %2202 = vmatmul.msk.f32.vlgmr.msrb.gmra.mxu0 %vm369_vm1, %v1573_v11  ;;  %2203 = vmatmul.msk.f32.vlgmr.msrb.gmra.mxu1 %vm369_vm1, %v1573_v11 }
 0x499   : > { %2204 = vmatmul.msk.f32.vlgmr.msrb.gmra.mxu2 %vm369_vm1, %v1573_v11 }
 0x515   : > { %v1593_v59 = vpop.f32.mrf.mxu0  ;;  %v1613_v62 = vpop.f32.mrf.mxu1 }
 0x516   : > { %v1637_v55 = vrot.slane %v1593_v59, 2  ;;  %v1638_v57 = vrot.slane %v1593_v59, 3  ;;  %v1682_v63 = vrot.slane %v1613_v62, 2  ;;  %v1683_v53 = vrot.slane %v1613_v62, 3 }
 0x518   : > { %v1641_v58 = vadd.f32 %v1637_v55, %v3166_v31  ;;  %v1642_v0 = vadd.f32 %v1638_v57, %v3169_v38  ;;  %v1686_v5 = vadd.f32 %v1682_v63, %v3172_v41  ;;  %v1687_v9 = vadd.f32 %v1683_v53, %v3174_v42 }
 0x51a   : > { %v2205_v8 = vmul.f32 -1.442695, %v1641_v58  ;;  %v2206_v2 = vmul.f32 -1.442695, %v1642_v0  ;;  %v2207_v13 = vmul.f32 -1.442695, %v1686_v5 }
 0x51b   : > { %v2208_v16 = vmul.f32 -1.442695, %v1687_v9 }
 0x51c   : > { %2498 = vpow2.f32 %v2205_v8  ;;  %v1633_v27 = vpop.f32.mrf.mxu2 }
 0x51d   : > { %2500 = vpow2.f32 %v2206_v2  ;;  %v1634_v22 = vadd.f32 %v3419_v7, %v1633_v27 }
 0x51e   : > { %2502 = vpow2.f32 %v2207_v13 }
 0x51f   : > { %2504 = vpow2.f32 %v2208_v16  ;;  %v1727_v29 = vrot.slane %v1634_v22, 2  ;;  %v1728_v40 = vrot.slane %v1634_v22, 3 }
 0x522   : > { %v2499_v21 = vpop.eup %2498 }
 0x523   : > { %v2501_v4 = vpop.eup %2500  ;;  %v1649_v17 = vadd.f32 1.0, %v2499_v21 }
 0x524   : > { %v2503_v24 = vpop.eup %2502  ;;  %v1650_v6 = vadd.f32 1.0, %v2501_v4 }
 0x525   : > { %v2505_v60 = vpop.eup %2504  ;;  %2506 = vrcp.f32 %v1649_v17  ;;  %v3503_v19 = vadd.f32 1.0, %v2503_v24  ;;  %v1660_v28 = vand.u32 2147483647, %v1649_v17  ;;  %v1662_v1 = vand.u32 2147483648, %v1649_v17 }
 0x526   : > { %2508 = vrcp.f32 %v1650_v6  ;;  %v3505_v10 = vadd.f32 1.0, %v2505_v60  ;;  %v1675_v39 = vand.u32 2147483647, %v1650_v6  ;;  %v1677_v3 = vand.u32 2147483648, %v1650_v6 }
 0x527   : > { %2510 = vrcp.f32 %v3503_v19  ;;  %vm1656_vm14 = vweird.f32 %v1649_v17  ;;  %vm1671_vm15 = vweird.f32 %v1650_v6  ;;  %v1707_v48 = vand.u32 2147483648, %v3503_v19 }
 0x528   : > { %2512 = vrcp.f32 %v3505_v10  ;;  %v1663_v52 = vor.u32 1.1754944e-38, %v1662_v1  ;;  %vm1661_vm2 = vcmp.eq.f32.partialorder %v1660_v28, 8.507059e+37  ;;  %vm1676_vm6 = vcmp.eq.f32.partialorder %v1675_v39, 8.507059e+37 }
 0x529   : > { %v1678_v56 = vor.u32 1.1754944e-38, %v1677_v3  ;;  %vm1701_vm9 = vweird.f32 %v3503_v19  ;;  %v1705_v57 = vand.u32 2147483647, %v3503_v19  ;;  %v1722_v63 = vand.u32 2147483648, %v3505_v10 }
 0x52a   : > { %vm1716_vm11 = vweird.f32 %v3505_v10  ;;  %v1720_v58 = vand.u32 2147483647, %v3505_v10  ;;  %v1708_v8 = vor.u32 1.1754944e-38, %v1707_v48  ;;  %v1742_v60 = vrot.slane %v3487_v47, 7 }
 0x52b   : > { %v2507_v30 = vpop.eup %2506  ;;  %v1723_v13 = vor.u32 1.1754944e-38, %v1722_v63 }
 0x52c   : > { %v2509_v32 = vpop.eup %2508  ;;  %v1652_v25 = vmul.f32 %v2507_v30, %v1649_v17  ;;  %vm1657_vm12 = vweird.f32 %v2507_v30  ;;  %v1741_v17 = vrot.slane %v3485_v49, 7 }
 0x52d   : > { %v2511_v15 = vpop.eup %2510  ;;  %v1667_v18 = vmul.f32 %v2509_v32, %v1650_v6  ;;  %vm1672_vm13 = vweird.f32 %v2509_v32  ;;  %vm1658_vm0 = vmor %vm1656_vm14, %vm1657_vm12  ;;  %vm1721_vm14 = vcmp.eq.f32.partialorder %v1720_v58, 8.507059e+37 }
 0x52e   : > { %v2513_v20 = vpop.eup %2512  ;;  %v1697_v12 = vmul.f32 %v2511_v15, %v3503_v19  ;;  %v1653_v26 = vsub.f32 1.0, %v1652_v25  ;;  %vm1673_vm5 = vmor %vm1671_vm15, %vm1672_vm13  ;;  %vm1702_vm7 = vweird.f32 %v2511_v15  ;;  %vm1706_vm13 = vcmp.eq.f32.partialorder %v1705_v57, 8.507059e+37 }
 0x52f   : > { %v1712_v33 = vmul.f32 %v2513_v20, %v3505_v10  ;;  %v1668_v34 = vsub.f32 1.0, %v1667_v18  ;;  %vm1717_vm8 = vweird.f32 %v2513_v20  ;;  %vm1703_vm10 = vmor %vm1701_vm9, %vm1702_vm7  ;;  %vm1749_vm15 = vcmask 260102  }
 0x530   : > { %v1698_v44 = vsub.f32 1.0, %v1697_v12  ;;  %v1654_v50 = vmul.f32 %v2507_v30, %v1653_v26  ;;  %vm1718_vm12 = vmor %vm1716_vm11, %vm1717_vm8 }
 0x531   : > { %v1713_v36 = vsub.f32 1.0, %v1712_v33  ;;  %v1669_v37 = vmul.f32 %v2509_v32, %v1668_v34 }
 0x532   : > { %v1699_v43 = vmul.f32 %v2511_v15, %v1698_v44  ;;  %v1655_v45 = vadd.f32 %v2507_v30, %v1654_v50 }
 0x533   : > { %v1714_v51 = vmul.f32 %v2513_v20, %v1713_v36  ;;  %v1670_v54 = vadd.f32 %v2509_v32, %v1669_v37 }
 0x534   : > { %v1659_v46 = vsel %vm1658_vm0, %v2507_v30, %v1655_v45  ;;  %v1700_v61 = vadd.f32 %v2511_v15, %v1699_v43 }
 0x535   : > { %v1664_v23 = vsel %vm1661_vm2, %v1663_v52, %v1659_v46  ;;  %v1674_v11 = vsel %vm1673_vm5, %v2509_v32, %v1670_v54  ;;  %v1715_v59 = vadd.f32 %v2513_v20, %v1714_v51 }
 0x536   : > { %v1679_v62 = vsel %vm1676_vm6, %v1678_v56, %v1674_v11  ;;  %v1731_v55 = vmul.f32 %v1727_v29, %v1664_v23  ;;  %v1704_v5 = vsel %vm1703_vm10, %v2511_v15, %v1700_v61 }
 0x537   : > { %v1732_v53 = vmul.f32 %v1728_v40, %v1679_v62  ;;  %v1719_v2 = vsel %vm1718_vm12, %v2513_v20, %v1715_v59  ;;  %v1709_v16 = vsel %vm1706_vm13, %v1708_v8, %v1704_v5 }
 0x538   : > { %v1733_v0 = vadd.f32 %v1731_v55, %v3187_v14  ;;  %v1724_v21 = vsel %vm1721_vm14, %v1723_v13, %v1719_v2  ;;  %v1737_v4 = vsub.f32 1.0, %v1709_v16  ;;  %v1745_v27 = vmul.f32 %v1741_v17, %v1709_v16 }
 0x539   : > { %v1734_v9 = vadd.f32 %v1732_v53, %v3189_v35  ;;  %v1738_v6 = vsub.f32 1.0, %v1724_v21  ;;  %v1746_v30 = vmul.f32 %v1742_v60, %v1724_v21 }
 0x53a   : > { %2514 = vtanh.f32 %v1733_v0 }
 0x53b   : > { %2516 = vtanh.f32 %v1734_v9 }
 0x540   : > { %v2515_v24 = vpop.eup %2514 }
 0x541   : > { %v2517_v19 = vpop.eup %2516  ;;  %v1739_v10 = vmul.f32 %v2515_v24, %v1737_v4 }
 0x542   : > { %v1740_v22 = vmul.f32 %v2517_v19, %v1738_v6 }
 0x543   : > { %v3522_v32 = vadd.f32 %v1745_v27, %v1739_v10 }
 0x544   : > { %v3524_v25 = vadd.f32 %v1746_v30, %v1740_v22 }
 0x545   : > { %1750 = vst.msk [vmem:[%s3077_s19] sm:$0x40] %vm1749_vm15, %v3522_v32  ;;  %v1754_v15 = vrot.slane %v3522_v32, 6 }
 0x546   : > { %1751 = vst.msk [vmem:[%s3077_s19 + $0x8] sm:$0x40] %vm1749_vm15, %v3524_v25  ;;  %v1755_v49 = vrot.slane %v3524_v25, 5 }
 0x548   : > { %v1756_v47 = vsel %vm662_vm4, %v1755_v49, %v1754_v15 }
 0x549   : > { %2209 = vmatmul.msk.f32.vlgmr.msra.gmra.mxu3 %vm369_vm1, %v1756_v47  ;;  %2210 = vmatmul.msk.f32.vlgmr.msra.gmra.mxu0 %vm369_vm1, %v1756_v47 }
 0x54a   : > { %2211 = vmatmul.msk.f32.vlgmr.msra.gmra.mxu1 %vm369_vm1, %v1756_v47 }
 0x5c6   : > { %v1796_v18 = vpop.f32.mrf.mxu0 }
 0x5c7   : > { %v1865_v20 = vrot.slane %v1796_v18, 1  ;;  %v1866_v12 = vrot.slane %v1796_v18, 2  ;;  %v1816_v52 = vpop.f32.mrf.mxu1 }
 0x5c8   : > { %v1817_v61 = vadd.f32 %v3419_v7, %v1816_v52 }
 0x5c9   : > { %v1869_v26 = vadd.f32 %v1865_v20, %v3172_v41  ;;  %v1870_v28 = vadd.f32 %v1866_v12, %v3174_v42 }
 0x5ca   : > { %v1910_v63 = vrot.slane %v1817_v61, 1  ;;  %v1911_v16 = vrot.slane %v1817_v61, 2 }
 0x5cb   : > { %v2214_v29 = vmul.f32 -1.442695, %v1869_v26  ;;  %v2215_v33 = vmul.f32 -1.442695, %v1870_v28 }
 0x5cc   : > { %v1776_v1 = vpop.f32.mrf.mxu3 }
 0x5cd   : > { %2518 = vpow2.f32 %v2214_v29  ;;  %v1820_v34 = vrot.slane %v1776_v1, 1  ;;  %v1821_v39 = vrot.slane %v1776_v1, 2 }
 0x5ce   : > { %2520 = vpow2.f32 %v2215_v33 }
 0x5cf   : > { %v1824_v44 = vadd.f32 %v1820_v34, %v3166_v31  ;;  %v1825_v50 = vadd.f32 %v1821_v39, %v3169_v38 }
 0x5d1   : > { %v2212_v3 = vmul.f32 -1.442695, %v1824_v44  ;;  %v2213_v36 = vmul.f32 -1.442695, %v1825_v50  ;;  %v1924_v44 = vrot.slane %v3522_v32, 7 }
 0x5d3   : > { %v2519_v37 = vpop.eup %2518  ;;  %2522 = vpow2.f32 %v2212_v3  ;;  %v1925_v3 = vrot.slane %v3524_v25, 7 }
 0x5d4   : > { %v2521_v40 = vpop.eup %2520  ;;  %v3540_v43 = vadd.f32 1.0, %v2519_v37  ;;  %2524 = vpow2.f32 %v2213_v36 }
 0x5d5   : > { %v3542_v41 = vadd.f32 1.0, %v2521_v40 }
 0x5d6   : > { %2526 = vrcp.f32 %v3540_v43  ;;  %v1890_v4 = vand.u32 2147483648, %v3540_v43  ;;  %vm1884_vm11 = vweird.f32 %v3540_v43  ;;  %v1888_v49 = vand.u32 2147483647, %v3540_v43 }
 0x5d7   : > { %2528 = vrcp.f32 %v3542_v41  ;;  %v1905_v47 = vand.u32 2147483648, %v3542_v41  ;;  %vm1899_vm13 = vweird.f32 %v3542_v41  ;;  %v1903_v20 = vand.u32 2147483647, %v3542_v41 }
 0x5d8   : > { %v1891_v29 = vor.u32 1.1754944e-38, %v1890_v4  ;;  %vm1889_vm15 = vcmp.eq.f32.partialorder %v1888_v49, 8.507059e+37 }
 0x5d9   : > { %v2523_v42 = vpop.eup %2522  ;;  %v1906_v1 = vor.u32 1.1754944e-38, %v1905_v47 }
 0x5da   : > { %v2525_v45 = vpop.eup %2524  ;;  %v1832_v48 = vadd.f32 1.0, %v2523_v42 }
 0x5db   : > { %v1833_v31 = vadd.f32 1.0, %v2525_v45 }
 0x5dc   : > { %2530 = vrcp.f32 %v1832_v48  ;;  %v3546_v38 = vpop.eup %2526  ;;  %v1845_v53 = vand.u32 2147483648, %v1832_v48  ;;  %v1843_v5 = vand.u32 2147483647, %v1832_v48  ;;  %vm1839_vm0 = vweird.f32 %v1832_v48 }
 0x5dd   : > { %2532 = vrcp.f32 %v1833_v31  ;;  %v3548_v51 = vpop.eup %2528  ;;  %v1880_v54 = vmul.f32 %v3546_v38, %v3540_v43  ;;  %v1860_v9 = vand.u32 2147483648, %v1833_v31  ;;  %v1858_v13 = vand.u32 2147483647, %v1833_v31 }
 0x5de   : > { %v1895_v46 = vmul.f32 %v3548_v51, %v3542_v41  ;;  %v1846_v17 = vor.u32 1.1754944e-38, %v1845_v53  ;;  %vm1854_vm5 = vweird.f32 %v1833_v31  ;;  %vm1885_vm6 = vweird.f32 %v3546_v38 }
 0x5df   : > { %v1881_v59 = vsub.f32 1.0, %v1880_v54  ;;  %vm1844_vm7 = vcmp.eq.f32.partialorder %v1843_v5, 8.507059e+37  ;;  %v1861_v60 = vor.u32 1.1754944e-38, %v1860_v9  ;;  %vm1859_vm9 = vcmp.eq.f32.partialorder %v1858_v13, 8.507059e+37  ;;  %vm1886_vm12 = vmor %vm1884_vm11, %vm1885_vm6 }
 0x5e0   : > { %v1896_v55 = vsub.f32 1.0, %v1895_v46  ;;  %vm1900_vm10 = vweird.f32 %v3548_v51 }
 0x5e1   : > { %v1882_v8 = vmul.f32 %v3546_v38, %v1881_v59  ;;  %vm1901_vm14 = vmor %vm1899_vm13, %vm1900_vm10 }
 0x5e2   : > { %v2531_v56 = vpop.eup %2530  ;;  %v1897_v7 = vmul.f32 %v3548_v51, %v1896_v55 }
 0x5e3   : > { %v2533_v23 = vpop.eup %2532  ;;  %v1835_v11 = vmul.f32 %v2531_v56, %v1832_v48  ;;  %vm1840_vm1 = vweird.f32 %v2531_v56  ;;  %v1883_v19 = vadd.f32 %v3546_v38, %v1882_v8 }
 0x5e4   : > { %v1850_v62 = vmul.f32 %v2533_v23, %v1833_v31  ;;  %vm1855_vm4 = vweird.f32 %v2533_v23  ;;  %vm1841_vm2 = vmor %vm1839_vm0, %vm1840_vm1  ;;  %v1898_v22 = vadd.f32 %v3548_v51, %v1897_v7  ;;  %vm1904_vm1 = vcmp.eq.f32.partialorder %v1903_v20, 8.507059e+37 }
 0x5e5   : > { %v1836_v57 = vsub.f32 1.0, %v1835_v11  ;;  %vm1856_vm8 = vmor %vm1854_vm5, %vm1855_vm4  ;;  %v1887_v26 = vsel %vm1886_vm12, %v3546_v38, %v1883_v19  ;;  %vm1932_vm4 = vcmask 261127  }
 0x5e6   : > { %v1851_v58 = vsub.f32 1.0, %v1850_v62  ;;  %v1902_v33 = vsel %vm1901_vm14, %v3548_v51, %v1898_v22  ;;  %v1892_v34 = vsel %vm1889_vm15, %v1891_v29, %v1887_v26 }
 0x5e7   : > { %v1837_v0 = vmul.f32 %v2531_v56, %v1836_v57  ;;  %v1907_v39 = vsel %vm1904_vm1, %v1906_v1, %v1902_v33  ;;  %v1928_v37 = vmul.f32 %v1924_v44, %v1892_v34 }
 0x5e8   : > { %v1852_v2 = vmul.f32 %v2533_v23, %v1851_v58  ;;  %v1921_v36 = vsub.f32 1.0, %v1907_v39  ;;  %v1929_v43 = vmul.f32 %v1925_v3, %v1907_v39 }
 0x5e9   : > { %v1838_v21 = vadd.f32 %v2531_v56, %v1837_v0 }
 0x5ea   : > { %v1853_v24 = vadd.f32 %v2533_v23, %v1852_v2 }
 0x5eb   : > { %v1842_v6 = vsel %vm1841_vm2, %v2531_v56, %v1838_v21 }
 0x5ec   : > { %v1847_v10 = vsel %vm1844_vm7, %v1846_v17, %v1842_v6  ;;  %v1857_v27 = vsel %vm1856_vm8, %v2533_v23, %v1853_v24 }
 0x5ed   : > { %v1862_v30 = vsel %vm1859_vm9, %v1861_v60, %v1857_v27  ;;  %v1914_v15 = vmul.f32 %v1910_v63, %v1847_v10 }
 0x5ee   : > { %v1915_v18 = vmul.f32 %v1911_v16, %v1862_v30 }
 0x5ef   : > { %v1916_v12 = vadd.f32 %v1914_v15, %v3187_v14  ;;  %v1920_v14 = vsub.f32 1.0, %v1892_v34 }
 0x5f0   : > { %v1917_v28 = vadd.f32 %v1915_v18, %v3189_v35 }
 0x5f1   : > { %2534 = vtanh.f32 %v1916_v12 }
 0x5f2   : > { %2536 = vtanh.f32 %v1917_v28 }
 0x5f7   : > { %v2535_v50 = vpop.eup %2534 }
 0x5f8   : > { %v2537_v35 = vpop.eup %2536  ;;  %v1922_v40 = vmul.f32 %v2535_v50, %v1920_v14 }
 0x5f9   : > { %v1923_v41 = vmul.f32 %v2537_v35, %v1921_v36 }
 0x5fa   : > { %v1930_v42 = vadd.f32 %v1928_v37, %v1922_v40 }
 0x5fb   : > { %v1931_v45 = vadd.f32 %v1929_v43, %v1923_v41  ;;  %1945 = sbr.rel (%p2216_p1) target bundleno = 1538 (0x602), region = 64 }
 0x5fc   : > { %1933 = vst.msk [vmem:[%s3077_s19] sm:$0x80] %vm1932_vm4, %v1930_v42 }
 0x5fd   : > { %1934 = vst.msk [vmem:[%s3077_s19 + $0x8] sm:$0x80] %vm1932_vm4, %v1931_v45  ;;  %v1937_v48 = vrot.slane %v1931_v45, 7 }
 0x5fe   : > { %1940 = vst.msk [vmem:[#allocation2 - $0x7] sm:$0x80] %vm1932_vm4, %v1930_v42 }
 0x5ff   : > { %1941 = vst.msk [vmem:[#allocation2 + $0x1] sm:$0x1] %vm656_vm3, %v1937_v48 }
 0x600   : > { %1946 = vst.msk [vmem:[%s3079_s12 - $0x7] sm:$0x80] %vm1932_vm4, %v1930_v42 }
 0x601   : > { %1947 = vst.msk [vmem:[%s3079_s12 + $0x1] sm:$0x1] %vm656_vm3, %v1937_v48 }
 0x602 PF: > { %s3719_s11 = sld [smem:[#allocation21_spill]]  ;;  %s1968_s8 = sshll.u32 %s3077_s19, 4  ;;  %s1969_s8 = int_to_ptr.vmem [resolvable:$true] %s1968_s8 }
 0x603   : > { %s3721_s28 = sld [smem:[#allocation33_spill]]  ;;  %s1949_s24 = scalar_lea.sflag [#allocation5], %s3056_s1 }
 0x608   : > { %s2226_s18 = sshll.u32 %s3719_s11, 2 }
 0x609   : > { %s1965_s9 = sadd.s32 %s2817_s27, %s2226_s18  ;;  %s3722_s14 = smov %s3721_s28 }
 0x60a   : > { %s2221_s3 = sshll.u32 %s1965_s9, 3  ;;  %s2691_s27 = scalar_lea.hbm %s3722_s14, 64 }
 0x60b   : > { %s1967_s10 = scalar_lea.hbm %s3721_s28, %s2221_s3 }
 0x60c   : > { %s1970_s21 = sshll.u32 %s1967_s10, 4  ;;  %s1971_s21 = int_to_ptr.hbm [resolvable:$true] %s1970_s21 }
 0x60d   : > { %s2685_s16 = sshra.s32 %s1971_s21, 4  ;;  %s2686_s16 = int_to_ptr.hbm [resolvable:$true] %s2685_s16 }
 0x60e   : > { %s2687_s4 = scalar_lea.hbm %s2686_s16, 16  ;;  %p2692_p7 = scmp.lt.s32.totalorder %s2686_s16, %s3722_s14 }
 0x60f   : > { %p2688_p10 = scmp.ne.s32.totalorder %s2686_s16, %s2687_s4  ;;  %p2693_p9 = scmp.lt.s32.totalorder %s2691_s27, %s2687_s4 }
 0x611   : > { %p2689_p12 = pnand %p2688_p10, %p3021_p11  ;;  %p2694_p13 = por %p2693_p9, %p2692_p7 }
 0x613   : > { %p2690_p5 = pneg %p2689_p12 }
 0x615   : > { %p2695_p0 = pnand %p2694_p13, %p2690_p5 }
 0x617   : > { %2698 = shalt.err (!%p2695_p0)
}
 0x618   : > { %s2844_s1 = smov 128   ;;  %s2845_s3 = smov 256  }
 0x619   : > { %s2846_s5 = smov 8   ;;  %s2222_s0 = sshll.u32 %s3719_s11, 1 }
 0x61a   : > { %2241 = dma.vmem_to_hbm [thread:$0]  (%p3021_p11), %s1969_s8, 256, %s1971_s21, %s1949_s24, %s2844_s1, %s2845_s3, %s2846_s5  }
 0x61b   : > { %s3724_s28 = sld [smem:[#allocation34_spill]]  ;;  %s1985_s16 = sshll.u32 %s3079_s12, 4  ;;  %s1986_s16 = int_to_ptr.vmem [resolvable:$true] %s1985_s16 }
 0x61c   : > { %s3726_s27 = sand.u32 1, %s2797_s22  }
 0x61d   : > { %s1954_s18 = scalar_lea.sflag [#allocation13], %s3726_s27 }
 0x621   : > { %s3725_s10 = smov %s3724_s28  ;;  %s1983_s19 = scalar_lea.hbm %s3724_s28, %s2222_s0 }
 0x622   : > { %s1987_s4 = sshll.u32 %s1983_s19, 4  ;;  %s2719_s11 = scalar_lea.hbm %s3725_s10, 4  ;;  %s1988_s4 = int_to_ptr.hbm [resolvable:$true] %s1987_s4 }
 0x623   : > { %s2713_s14 = sshra.s32 %s1988_s4, 4  ;;  %s2714_s14 = int_to_ptr.hbm [resolvable:$true] %s2713_s14 }
 0x624   : > { %s2715_s15 = scalar_lea.hbm %s2714_s14, 2  ;;  %p2720_p11 = scmp.lt.s32.totalorder %s2714_s14, %s3725_s10 }
 0x625   : > { %p2716_p3 = scmp.ne.s32.totalorder %s2714_s14, %s2715_s15  ;;  %p2721_p1 = scmp.lt.s32.totalorder %s2719_s11, %s2715_s15 }
 0x627   : > { %p2717_p2 = pnand %p2716_p3, %p2965_p8  ;;  %p2722_p10 = por %p2721_p1, %p2720_p11 }
 0x629   : > { %p2718_p4 = pneg %p2717_p2 }
 0x62b   : > { %p2723_p12 = pnand %p2722_p10, %p2718_p4 }
 0x62d   : > { %2726 = shalt.err (!%p2723_p12)
}
 0x62e   : > { %2242 = dma.vmem_to_hbm [thread:$0]  (%p2965_p8), %s1986_s16, 32, %s1988_s4, %s1954_s18  }
 0x62f PF: > { %s3727_s12 = sld [smem:[#allocation20_spill]]  ;;  %p2273_p5 = scmp.ge.s32.totalorder %s2833_s7, 2 }
 0x631   : > { %p2260_p7 = pnand %p2273_p5, %p2957_p6 }
 0x633   : > { %p2261_p9 = pneg %p2260_p7 }
 0x635   : > { %s1999_s3 = sand.u32 1, %s3727_s12  }
 0x636   : > { %s2000_s5 = scalar_lea.sflag [#allocation5], %s1999_s3 }
 0x637   : > { %2784 = dma.done.wait (%p2261_p9), %s2000_s5, 256  }
 0x638   : > { %2786 = vsyncadd (%p2261_p9), %s2000_s5, 4294967040  ;;  %s3729_s14 = sld [smem:[#allocation19_spill]] }
 0x639   : > { %s3730_s15 = sld [smem:[#allocation24_spill]] }
 0x63e   : > { %s2009_s0 = sand.u32 1, %s3729_s14  }
 0x63f   : > { %p3731_p13 = scmp.ne.s32.totalorder %s3730_s15, 0  ;;  %s2010_s9 = scalar_lea.sflag [#allocation13], %s2009_s0 }
 0x641   : > { %p2263_p0 = pnand %p2273_p5, %p3731_p13 }
 0x643   : > { %p2264_p3 = pneg %p2263_p0 }
 0x645   : > { %2788 = dma.done.wait (%p2264_p3), %s2010_s9, 32  }
 0x646   : > { %2790 = vsyncadd (%p2264_p3), %s2010_s9, 4294967264  ;;  %s28_s7 = sadd.s32 1, %s2833_s7   ;;  %s3732_s2 = sld [smem:[#allocation25_spill]] }
 0x647   : > { %p25_p8 = scmp.ge.s32.totalorder %s28_s7, 6   ;;  %s3733_s6 = sld [smem:[#allocation27_spill]] }
 0x648   : > { %s3734_s21 = smov %s2797_s22  ;;  %s3735_s22 = smov %s2801_s23 }
 0x649   : > { %s3736_s23 = smov %s3037_s20  ;;  %s3737_s24 = smov %s2809_s25 }
 0x64a   : > { %s3738_s25 = smov %s2813_s26  ;;  %s3739_s26 = smov %s3040_s17 }
 0x64b   : > { %s3740_s27 = smov %s2825_s29  ;;  %s3741_s28 = smov %s2829_s30 }
 0x64c   : > { %s3742_s29 = smov %s3732_s2  ;;  %27 = sbr.rel (!%p25_p8) target bundleno = 21 (0x15), region = 128 }
 0x64d   : > { %s3743_s30 = smov %s3733_s6 }
 0x651   :  { %2016 = vsyncpa [#allocation4], 1 }
 0x652   :  { %2018 = vsyncpa [#allocation4 + $0x1], 1 }
 0x653   :  { %2019 = vsyncpa [#allocation7], 1 }
 0x654   :  { %2020 = vsyncpa [#allocation10], 1 }
 0x655   :  { %2021 = vsyncpa [#allocation5], 1 }
 0x656   :  { %2023 = vsyncpa [#allocation5 + $0x1], 1 }
 0x657   :  { %2024 = vsyncpa [#allocation13], 1 }
 0x658   :  { %2026 = vsyncpa [#allocation13 + $0x1], 1 }

</bundles_post_ra>
